<compile_context>
chip_gen: v7x
topology: tpu7x:2x2x1
jax: 0.10.0
libtpu: 0.0.40
codegen_flags: <defaults>
</compile_context>

<pallas_src>
import math

import jax
import jax.numpy as jnp
from jax.experimental import pallas as pl
from jax.experimental.pallas import tpu as pltpu


def _round_up(x, m):
    return ((x + m - 1) // m) * m


def qnetwork_kernel(x_ref, w1_ref, b1_ref, w2_ref, b2_ref, w3_ref, b3_ref, out_ref):
    # fc1 + ReLU: cast the f32 activation tile to bf16 in-kernel (no wrapper
    # astype / extra HBM round trip), accumulate in f32 on the MXU.
    x = x_ref[...].astype(w1_ref.dtype)
    h1 = jnp.dot(x, w1_ref[...], preferred_element_type=jnp.float32)
    h1 = jnp.maximum(h1 + b1_ref[...], 0.0)
    # fc2 + ReLU
    h2 = jnp.dot(h1.astype(w2_ref.dtype), w2_ref[...],
                 preferred_element_type=jnp.float32)
    h2 = jnp.maximum(h2 + b2_ref[...], 0.0)
    # fc3 (raw Q-values, lane-padded to 128)
    q = jnp.dot(h2.astype(w3_ref.dtype), w3_ref[...],
                preferred_element_type=jnp.float32)
    out_ref[...] = (q + b3_ref[...]).astype(out_ref.dtype)


def prepare_qnetwork_params(params, *, mxu_dtype=jnp.bfloat16):
    """One-time (per parameter update) conversion for the fused kernel:
    weights -> bf16 MXU dtype, biases -> f32, fc3 weight/bias zero-padded to a
    128-lane-dense output. Do this OUTSIDE the per-step forward path."""
    w1, b1, w2, b2, w3, b3 = (
        params["w1"], params["b1"], params["w2"],
        params["b2"], params["w3"], params["b3"],
    )
    n_actions = w3.shape[1]
    a_pad = max(128, _round_up(n_actions, 128))
    w3p = jnp.pad(w3, ((0, 0), (0, a_pad - n_actions)))
    b3p = jnp.pad(b3, ((0, 0), (0, a_pad - n_actions)))
    return {
        "w1": w1.astype(mxu_dtype), "b1": b1.astype(jnp.float32),
        "w2": w2.astype(mxu_dtype), "b2": b2.astype(jnp.float32),
        "w3": w3p.astype(mxu_dtype), "b3": b3p.astype(jnp.float32),
        "n_actions": n_actions,
    }


def qnetwork_forward(state, prepared, *, block_b=1024, out_dtype=jnp.float32,
                     min_grid_steps=1):
    """Fused QNetwork forward.

    state:    [B, input_dim] float32
    prepared: output of prepare_qnetwork_params (bf16 weights, padded fc3).
    block_b:  batch tile (rounded to a multiple of 16).
    out_dtype: jnp.float32 for PyTorch parity; jnp.bfloat16 halves the output
               writeback stream (the main HBM stream on v6e at large batch).
    min_grid_steps: set to 2 on v7x so the parallel batch axis can shard
               across both TensorCores.
    Returns [B, n_actions] out_dtype.
    """
    w1, b1, w2, b2, w3, b3 = (
        prepared["w1"], prepared["b1"], prepared["w2"],
        prepared["b2"], prepared["w3"], prepared["b3"],
    )
    n_actions = prepared["n_actions"]
    B, D = state.shape
    fc1 = w1.shape[1]
    fc2 = w2.shape[1]
    a_pad = w3.shape[1]

    # Minimal batch padding: only up to a multiple of 16 rows (sublane
    # granularity for the bf16 matmul operand), no dtype round trip.
    b16 = _round_up(B, 16)
    x = state if b16 == B else jnp.pad(state, ((0, b16 - B), (0, 0)))

    # Batch tile: multiple of 16, no larger than the (padded) batch; optionally
    # split into >= min_grid_steps tiles (v7x dual-TensorCore sharding).
    tb = min(_round_up(block_b, 16), b16)
    if min_grid_steps > 1:
        tb = min(tb, _round_up(pl.cdiv(b16, min_grid_steps), 16))
    grid_b = pl.cdiv(b16, tb)

    grid_spec = pltpu.PrefetchScalarGridSpec(
        num_scalar_prefetch=0,
        grid=(grid_b,),
        in_specs=[
            # activations: tiled over batch, auto double-buffered
            pl.BlockSpec((tb, D), lambda i: (i, 0)),
            # weights / biases: constant block index -> stay VMEM-resident
            # across grid steps (no per-step weight re-DMA).
            pl.BlockSpec((D, fc1), lambda i: (0, 0)),
            pl.BlockSpec((1, fc1), lambda i: (0, 0)),
            pl.BlockSpec((fc1, fc2), lambda i: (0, 0)),
            pl.BlockSpec((1, fc2), lambda i: (0, 0)),
            pl.BlockSpec((fc2, a_pad), lambda i: (0, 0)),
            pl.BlockSpec((1, a_pad), lambda i: (0, 0)),
        ],
        out_specs=pl.BlockSpec((tb, a_pad), lambda i: (i, 0)),
    )

    out_padded = pl.pallas_call(
        qnetwork_kernel,
        out_shape=jax.ShapeDtypeStruct((b16, a_pad), out_dtype),
        grid_spec=grid_spec,
        compiler_params=pltpu.CompilerParams(
            # Megacore sharding on v7x; near-neutral on single-TC chips.
            # (If a v7x profile shows one TC idle, switch to
            #  pltpu.CORE_PARALLEL and pass min_grid_steps=2.)
            dimension_semantics=("parallel",),
            # Ample for tb<=2048 (out tile + f32 h1/h2 temps < ~8 MiB);
            # raises v5e's 16 MiB scoped default, below v7x's 64 MiB/TC.
            vmem_limit_bytes=32 * 1024 * 1024,
        ),
    )(x, w1, b1, w2, b2, w3, b3)

    # Slice padded batch rows / padded action lanes off outside the kernel.
    return out_padded[:B, :n_actions]


def init_qnetwork_params(key, input_dim, n_actions, fc1_dims=256, fc2_dims=256):
    """PyTorch nn.Linear-style init (uniform +-1/sqrt(fan_in)); weights are
    stored [in_dim, out_dim] (transposed vs PyTorch), biases [1, out_dim]."""
    keys = jax.random.split(key, 6)

    def linear(kw, kb, fan_in, fan_out):
        bound = 1.0 / math.sqrt(fan_in)
        w = jax.random.uniform(kw, (fan_in, fan_out), jnp.float32, -bound, bound)
        b = jax.random.uniform(kb, (1, fan_out), jnp.float32, -bound, bound)
        return w, b

    w1, b1 = linear(keys[0], keys[1], input_dim, fc1_dims)
    w2, b2 = linear(keys[2], keys[3], fc1_dims, fc2_dims)
    w3, b3 = linear(keys[4], keys[5], fc2_dims, n_actions)
    return {"w1": w1, "b1": b1, "w2": w2, "b2": b2, "w3": w3, "b3": b3}


if __name__ == "__main__":
    key = jax.random.PRNGKey(0)
    k_params, k_state = jax.random.split(key)

    # Shapes consistent with the module: input_dims=(8,), n_actions=4,
    # fc1_dims=fc2_dims=256.  Batch=500 exercises the pad-to-16 path (->512).
    batch, input_dim, n_actions = 500, 8, 4
    params = init_qnetwork_params(k_params, input_dim, n_actions)
    prepared = prepare_qnetwork_params(params)          # one-time hoisted prep
    state = jax.random.normal(k_state, (batch, input_dim), dtype=jnp.float32)

    # Default config: single large batch tile (tb=512, 1 grid step).
    q_values = qnetwork_forward(state, prepared)
    jax.block_until_ready(q_values)
    assert q_values.shape == (batch, n_actions)
    assert q_values.dtype == jnp.float32

    # Smaller tile config: 4 grid steps, weights stay VMEM-resident.
    q_values_tiled = qnetwork_forward(state, prepared, block_b=128)
    jax.block_until_ready(q_values_tiled)
    assert jnp.allclose(q_values, q_values_tiled, atol=1e-6, rtol=1e-6)

    # Reference with the same math as the kernel (bf16 MXU inputs, f32 accum).
    bf = jnp.bfloat16
    h1 = jnp.maximum(
        jnp.dot(state.astype(bf), params["w1"].astype(bf),
                preferred_element_type=jnp.float32) + params["b1"], 0.0)
    h2 = jnp.maximum(
        jnp.dot(h1.astype(bf), params["w2"].astype(bf),
                preferred_element_type=jnp.float32) + params["b2"], 0.0)
    ref_bf16 = jnp.dot(h2.astype(bf), params["w3"].astype(bf),
                       preferred_element_type=jnp.float32) + params["b3"]
    assert jnp.allclose(q_values, ref_bf16, atol=2e-2, rtol=2e-2)

    # Sanity check against the pure-f32 PyTorch-equivalent forward (loose
    # tolerance covers the bf16 MXU-input quantization).
    h1f = jnp.maximum(state @ params["w1"] + params["b1"], 0.0)
    h2f = jnp.maximum(h1f @ params["w2"] + params["b2"], 0.0)
    ref_f32 = h2f @ params["w3"] + params["b3"]
    assert jnp.allclose(q_values, ref_f32, atol=1e-1, rtol=1e-1)

    # TODO(synk): Adam optimizer / MSELoss from the PyTorch module are training
    # machinery, not part of the forward pass, and are not implemented here.
    print("KERNEL_OK")
</pallas_src>

<mosaic_0001>
module attributes {stable_mosaic.version = 11 : i64} {
  func.func @qnetwork_kernel(%arg0: i32, %arg1: memref<512x8xf32, #tpu.memory_space<vmem>>, %arg2: memref<8x256xbf16, #tpu.memory_space<vmem>>, %arg3: memref<1x256xf32, #tpu.memory_space<vmem>>, %arg4: memref<256x256xbf16, #tpu.memory_space<vmem>>, %arg5: memref<1x256xf32, #tpu.memory_space<vmem>>, %arg6: memref<256x128xbf16, #tpu.memory_space<vmem>>, %arg7: memref<1x128xf32, #tpu.memory_space<vmem>>, %arg8: memref<512x128xf32, #tpu.memory_space<vmem>>) attributes {dimension_semantics = [#tpu.dimension_semantics<parallel>], iteration_bounds = array<i64: 1>, scalar_prefetch = 0 : i64, scratch_operands = 0 : i64, tpu.core_type = #tpu.core_type<tc>, window_params = [{transform_indices = @transform_0, window_bounds = array<i64: 512, 8>}, {pipeline_mode = #tpu.pipeline_mode<synchronous>, transform_indices = @transform_1, window_bounds = array<i64: 8, 256>}, {pipeline_mode = #tpu.pipeline_mode<synchronous>, transform_indices = @transform_2, window_bounds = array<i64: 1, 256>}, {pipeline_mode = #tpu.pipeline_mode<synchronous>, transform_indices = @transform_3, window_bounds = array<i64: 256, 256>}, {pipeline_mode = #tpu.pipeline_mode<synchronous>, transform_indices = @transform_4, window_bounds = array<i64: 1, 256>}, {pipeline_mode = #tpu.pipeline_mode<synchronous>, transform_indices = @transform_5, window_bounds = array<i64: 256, 128>}, {pipeline_mode = #tpu.pipeline_mode<synchronous>, transform_indices = @transform_6, window_bounds = array<i64: 1, 128>}, {transform_indices = @transform_7, window_bounds = array<i64: 512, 128>}]} {
    %c0 = arith.constant 0 : index
    %c0_0 = arith.constant 0 : index
    %0 = vector.load %arg1[%c0, %c0_0] : memref<512x8xf32, #tpu.memory_space<vmem>>, vector<512x8xf32>
    %1 = arith.truncf %0 : vector<512x8xf32> to vector<512x8xbf16>
    %c0_1 = arith.constant 0 : index
    %c0_2 = arith.constant 0 : index
    %2 = vector.load %arg2[%c0_1, %c0_2] : memref<8x256xbf16, #tpu.memory_space<vmem>>, vector<8x256xbf16>
    %cst = arith.constant dense<0.000000e+00> : vector<512x256xf32>
    %3 = tpu.matmul %1, %2, %cst {dimension_numbers = #tpu.dot_dimension_numbers<[1], [0], [0], [1], [0, 0, 1, 1], [], []>} : vector<512x8xbf16>, vector<8x256xbf16>, vector<512x256xf32> -> vector<512x256xf32>
    %c0_3 = arith.constant 0 : index
    %c0_4 = arith.constant 0 : index
    %4 = vector.load %arg3[%c0_3, %c0_4] : memref<1x256xf32, #tpu.memory_space<vmem>>, vector<1x256xf32>
    %5 = vector.broadcast %4 : vector<1x256xf32> to vector<512x256xf32>
    %6 = arith.addf %3, %5 : vector<512x256xf32>
    %cst_5 = arith.constant 0.000000e+00 : f32
    %7 = vector.broadcast %cst_5 : f32 to vector<512x256xf32>
    %8 = arith.maximumf %6, %7 : vector<512x256xf32>
    %9 = arith.truncf %8 : vector<512x256xf32> to vector<512x256xbf16>
    %c0_6 = arith.constant 0 : index
    %c0_7 = arith.constant 0 : index
    %10 = vector.load %arg4[%c0_6, %c0_7] : memref<256x256xbf16, #tpu.memory_space<vmem>>, vector<256x256xbf16>
    %cst_8 = arith.constant dense<0.000000e+00> : vector<512x256xf32>
    %11 = tpu.matmul %9, %10, %cst_8 {dimension_numbers = #tpu.dot_dimension_numbers<[1], [0], [0], [1], [0, 0, 1, 1], [], []>} : vector<512x256xbf16>, vector<256x256xbf16>, vector<512x256xf32> -> vector<512x256xf32>
    %c0_9 = arith.constant 0 : index
    %c0_10 = arith.constant 0 : index
    %12 = vector.load %arg5[%c0_9, %c0_10] : memref<1x256xf32, #tpu.memory_space<vmem>>, vector<1x256xf32>
    %13 = vector.broadcast %12 : vector<1x256xf32> to vector<512x256xf32>
    %14 = arith.addf %11, %13 : vector<512x256xf32>
    %cst_11 = arith.constant 0.000000e+00 : f32
    %15 = vector.broadcast %cst_11 : f32 to vector<512x256xf32>
    %16 = arith.maximumf %14, %15 : vector<512x256xf32>
    %17 = arith.truncf %16 : vector<512x256xf32> to vector<512x256xbf16>
    %c0_12 = arith.constant 0 : index
    %c0_13 = arith.constant 0 : index
    %18 = vector.load %arg6[%c0_12, %c0_13] : memref<256x128xbf16, #tpu.memory_space<vmem>>, vector<256x128xbf16>
    %cst_14 = arith.constant dense<0.000000e+00> : vector<512x128xf32>
    %19 = tpu.matmul %17, %18, %cst_14 {dimension_numbers = #tpu.dot_dimension_numbers<[1], [0], [0], [1], [0, 0, 1, 1], [], []>} : vector<512x256xbf16>, vector<256x128xbf16>, vector<512x128xf32> -> vector<512x128xf32>
    %c0_15 = arith.constant 0 : index
    %c0_16 = arith.constant 0 : index
    %20 = vector.load %arg7[%c0_15, %c0_16] : memref<1x128xf32, #tpu.memory_space<vmem>>, vector<1x128xf32>
    %21 = vector.broadcast %20 : vector<1x128xf32> to vector<512x128xf32>
    %22 = arith.addf %19, %21 : vector<512x128xf32>
    %c0_17 = arith.constant 0 : index
    %c0_18 = arith.constant 0 : index
    %23 = vector.load %arg8[%c0_17, %c0_18] : memref<512x128xf32, #tpu.memory_space<vmem>>, vector<512x128xf32>
    tpu.vector_store %arg8[%c0_17, %c0_18], %22 {strides = array<i32>} : memref<512x128xf32, #tpu.memory_space<vmem>>, vector<512x128xf32>,
    return
  }
  func.func @transform_0(%arg0: i32) -> (i32, i32) {
    %c0_i32 = arith.constant 0 : i32
    %c0_i32_0 = arith.constant 0 : i32
    return %arg0, %c0_i32 : i32, i32
  }
  func.func @transform_1(%arg0: i32) -> (i32, i32) {
    %c0_i32 = arith.constant 0 : i32
    %c0_i32_0 = arith.constant 0 : i32
    %c0_i32_1 = arith.constant 0 : i32
    return %c0_i32, %c0_i32_0 : i32, i32
  }
  func.func @transform_2(%arg0: i32) -> (i32, i32) {
    %c0_i32 = arith.constant 0 : i32
    %c0_i32_0 = arith.constant 0 : i32
    %c0_i32_1 = arith.constant 0 : i32
    return %c0_i32, %c0_i32_0 : i32, i32
  }
  func.func @transform_3(%arg0: i32) -> (i32, i32) {
    %c0_i32 = arith.constant 0 : i32
    %c0_i32_0 = arith.constant 0 : i32
    %c0_i32_1 = arith.constant 0 : i32
    return %c0_i32, %c0_i32_0 : i32, i32
  }
  func.func @transform_4(%arg0: i32) -> (i32, i32) {
    %c0_i32 = arith.constant 0 : i32
    %c0_i32_0 = arith.constant 0 : i32
    %c0_i32_1 = arith.constant 0 : i32
    return %c0_i32, %c0_i32_0 : i32, i32
  }
  func.func @transform_5(%arg0: i32) -> (i32, i32) {
    %c0_i32 = arith.constant 0 : i32
    %c0_i32_0 = arith.constant 0 : i32
    %c0_i32_1 = arith.constant 0 : i32
    return %c0_i32, %c0_i32_0 : i32, i32
  }
  func.func @transform_6(%arg0: i32) -> (i32, i32) {
    %c0_i32 = arith.constant 0 : i32
    %c0_i32_0 = arith.constant 0 : i32
    %c0_i32_1 = arith.constant 0 : i32
    return %c0_i32, %c0_i32_0 : i32, i32
  }
  func.func @transform_7(%arg0: i32) -> (i32, i32) {
    %c0_i32 = arith.constant 0 : i32
    %c0_i32_0 = arith.constant 0 : i32
    return %arg0, %c0_i32 : i32, i32
  }
}

</mosaic_0001>

<bundles_post_ra>
// kernel: tpu_custom_call.1
= control target key start
LH: loop header
LB: loop body
LE: loop exit
PB: predicated region body
PF: predicated region fallthrough
CT: control target
= control target key end

     0   :  { %vm239_vm0 = vcmask 1043456   ;;  %v2224_v5 = vmov 0   ;;  %vm142_vm1 = vcmask 64512   ;;  %s3146_s0 = inlined_call_operand.vmem [shape: f32[512,8], index: 0, kind: input, shape index: {}]   ;;  %s3147_s1 = inlined_call_operand.vmem [shape: bf16[8,256], index: 1, kind: input, shape index: {}]   ;;  %s3148_s2 = inlined_call_operand.vmem [shape: f32[1,256], index: 2, kind: input, shape index: {}]   ;;  %s3149_s3 = inlined_call_operand.vmem [shape: bf16[256,256], index: 3, kind: input, shape index: {}]   ;;  %s3150_s4 = inlined_call_operand.vmem [shape: f32[1,256], index: 4, kind: input, shape index: {}]   ;;  %s3151_s5 = inlined_call_operand.vmem [shape: bf16[256,128], index: 5, kind: input, shape index: {}]   ;;  %s3152_s6 = inlined_call_operand.vmem [shape: f32[1,128], index: 6, kind: input, shape index: {}]   ;;  %s3153_s7 = inlined_call_operand.hbm [shape: f32[512,128], index: 7, kind: output, shape index: {}]  }
   0x1   :  { %v124_v0 = vld [vmem:[%s3147_s1] sm:$0xff]  ;;  %v29_v2 = vld [vmem:[%s3146_s0 + $0x8] sm:$0xff]  ;;  %278 = vmatprep.mubr.bf16.mxu0 %v2224_v5  ;;  %438 = vmatprep.mubr.bf16.mxu1 %v2224_v5  ;;  %v30_v8 = vld [vmem:[%s3146_s0 + $0x10] sm:$0xff] }
   0x2   :  { %v28_v1 = vld [vmem:[%s3146_s0] sm:$0xff]  ;;  %v2045_v3 = vcombine.high %v124_v0, %v124_v0  ;;  %v2044_v4 = vcombine.low %v124_v0, %v124_v0  ;;  %v31_v9 = vld [vmem:[%s3146_s0 + $0x18] sm:$0xff]  ;;  %v61_v11 = vld [vmem:[%s3146_s0 + $0x108] sm:$0xff] }
   0x3   :  { %v92_v7 = vpack.c.bf16 %v29_v2, %v28_v1  ;;  %v60_v10 = vld [vmem:[%s3146_s0 + $0x100] sm:$0xff]  ;;  %v93_v15 = vpack.c.bf16 %v31_v9, %v30_v8  ;;  %v62_v16 = vld [vmem:[%s3146_s0 + $0x110] sm:$0xff]  ;;  %v63_v17 = vld [vmem:[%s3146_s0 + $0x118] sm:$0xff] }
   0x4   :  { %2046 = vmatprep.subr.msk.bf16.mxu0 %vm239_vm0, %v2045_v3  ;;  %v241_v6 = vsel %vm239_vm0, %v2044_v4, 0  ;;  %2128 = vmatprep.subr.msk.bf16.mxu1 %vm239_vm0, %v2045_v3  ;;  %v108_v12 = vpack.c.bf16 %v61_v11, %v60_v10  ;;  %v2136_v13 = vld [vmem:[%s3149_s3] ss:$8 sps:$4 sm:$0xff]   ;;  %v2138_v14 = vld [vmem:[%s3149_s3 + $0x4] ss:$8 sps:$4 sm:$0xff]   ;;  %v109_v20 = vpack.c.bf16 %v63_v17, %v62_v16  ;;  %v34_v32 = vld [vmem:[%s3146_s0 + $0x30] sm:$0xff] }
   0x5   :  { %247 = vmatpush1.bf16.msra.mxu0 %v241_v6  ;;  %2129 = vmatpush1.bf16.msra.mxu1 %v241_v6  ;;  %v2141_v18 = vld [vmem:[%s3149_s3 + $0x14] ss:$8 sps:$4 sm:$0xff]   ;;  %v2139_v19 = vld [vmem:[%s3149_s3 + $0x10] ss:$8 sps:$4 sm:$0xff]   ;;  %v2144_v21 = vld [vmem:[%s3149_s3 + $0x24] ss:$8 sps:$4 sm:$0xff]  }
   0x6   :  { %1675 = vmatprep.subr.bf16.mxu0 %v2224_v5  ;;  %995 = vmatprep.subr.bf16.mxu1 %v2138_v14  ;;  %v32_v22 = vld [vmem:[%s3146_s0 + $0x20] sm:$0xff]  ;;  %v33_v23 = vld [vmem:[%s3146_s0 + $0x28] sm:$0xff]  ;;  %v2147_v25 = vld [vmem:[%s3149_s3 + $0x34] ss:$8 sps:$4 sm:$0xff]  }
   0x7   :  { %v2142_v24 = vld [vmem:[%s3149_s3 + $0x20] ss:$8 sps:$4 sm:$0xff]   ;;  %v94_v26 = vpack.c.bf16 %v33_v23, %v32_v22  ;;  %v2145_v29 = vld [vmem:[%s3149_s3 + $0x30] ss:$8 sps:$4 sm:$0xff]   ;;  %v2150_v30 = vld [vmem:[%s3149_s3 + $0x44] ss:$8 sps:$4 sm:$0xff]  }
   0x8   :  { %2047 = vmatmul.mubr.msk.bf16.vlgmr.msra.gmra.mrb[0].mxu0 %vm142_vm1, %v92_v7  ;;  %2063 = vmatmul.mubr.msk.bf16.vlgmr.msra.gmra.mrb[0].mxu1 %vm142_vm1, %v108_v12  ;;  %v64_v27 = vld [vmem:[%s3146_s0 + $0x120] sm:$0xff]  ;;  %v65_v28 = vld [vmem:[%s3146_s0 + $0x128] sm:$0xff]  ;;  %v35_v33 = vld [vmem:[%s3146_s0 + $0x38] sm:$0xff] }
   0x9   :  { %288 = vmatprep.mubr.bf16.mxu0 %v2224_v5  ;;  %448 = vmatprep.mubr.bf16.mxu1 %v2224_v5  ;;  %v110_v31 = vpack.c.bf16 %v65_v28, %v64_v27  ;;  %v2148_v34 = vld [vmem:[%s3149_s3 + $0x40] ss:$8 sps:$4 sm:$0xff]   ;;  %v2153_v35 = vld [vmem:[%s3149_s3 + $0x54] ss:$8 sps:$4 sm:$0xff]   ;;  %v95_v36 = vpack.c.bf16 %v35_v33, %v34_v32  ;;  %v2151_v39 = vld [vmem:[%s3149_s3 + $0x50] ss:$8 sps:$4 sm:$0xff]  }
   0xa   :  { %996 = vmatpush1.bf16.msra.mxu1 %v2136_v13  ;;  %v66_v37 = vld [vmem:[%s3146_s0 + $0x130] sm:$0xff]  ;;  %v67_v38 = vld [vmem:[%s3146_s0 + $0x138] sm:$0xff]  ;;  %v2156_v40 = vld [vmem:[%s3149_s3 + $0x64] ss:$8 sps:$4 sm:$0xff]  }
   0xb   :  { %997 = vmatprep.subr.bf16.mxu1 %v2141_v18  ;;  %v111_v41 = vpack.c.bf16 %v67_v38, %v66_v37  ;;  %v36_v42 = vld [vmem:[%s3146_s0 + $0x40] sm:$0xff]  ;;  %v37_v43 = vld [vmem:[%s3146_s0 + $0x48] sm:$0xff]  ;;  %v2159_v45 = vld [vmem:[%s3149_s3 + $0x74] ss:$8 sps:$4 sm:$0xff]  }
   0xc   :  { %v2154_v44 = vld [vmem:[%s3149_s3 + $0x60] ss:$8 sps:$4 sm:$0xff]   ;;  %v96_v46 = vpack.c.bf16 %v37_v43, %v36_v42  ;;  %v2157_v49 = vld [vmem:[%s3149_s3 + $0x70] ss:$8 sps:$4 sm:$0xff]   ;;  %v2162_v50 = vld [vmem:[%s3149_s3 + $0x84] ss:$8 sps:$4 sm:$0xff]  }
   0xd   :  { %v68_v47 = vld [vmem:[%s3146_s0 + $0x140] sm:$0xff]  ;;  %v69_v48 = vld [vmem:[%s3146_s0 + $0x148] sm:$0xff]  ;;  %v38_v51 = vld [vmem:[%s3146_s0 + $0x50] sm:$0xff] }
   0xe   :  { %998 = vmatpush1.bf16.msra.mxu1 %v2139_v19  ;;  %v112_v52 = vpack.c.bf16 %v69_v48, %v68_v47  ;;  %v39_v53 = vld [vmem:[%s3146_s0 + $0x58] sm:$0xff]  ;;  %v2160_v54 = vld [vmem:[%s3149_s3 + $0x80] ss:$8 sps:$4 sm:$0xff]   ;;  %v70_v56 = vld [vmem:[%s3146_s0 + $0x150] sm:$0xff] }
   0xf   :  { %999 = vmatprep.subr.bf16.mxu1 %v2144_v21  ;;  %v2165_v55 = vld [vmem:[%s3149_s3 + $0x94] ss:$8 sps:$4 sm:$0xff]   ;;  %v97_v58 = vpack.c.bf16 %v39_v53, %v38_v51  ;;  %v2163_v59 = vld [vmem:[%s3149_s3 + $0x90] ss:$8 sps:$4 sm:$0xff]   ;;  %v2168_v60 = vld [vmem:[%s3149_s3 + $0xa4] ss:$8 sps:$4 sm:$0xff]  }
  0x10   :  { %2048 = vmatmul.mubr.msk.bf16.gmra.mrb[4].mxu0 %vm142_vm1, %v93_v15  ;;  %2064 = vmatmul.mubr.msk.bf16.gmra.mrb[4].mxu1 %vm142_vm1, %v109_v20  ;;  %v71_v57 = vld [vmem:[%s3146_s0 + $0x158] sm:$0xff]  ;;  %v40_v61 = vld [vmem:[%s3146_s0 + $0x60] sm:$0xff]  ;;  %v41_v62 = vld [vmem:[%s3146_s0 + $0x68] sm:$0xff] }
  0x11   :  { %298 = vmatprep.mubr.bf16.mxu0 %v2224_v5  ;;  %458 = vmatprep.mubr.bf16.mxu1 %v2224_v5  ;;  %v113_v63 = vpack.c.bf16 %v71_v57, %v70_v56  ;;  %v2166_v0 = vld [vmem:[%s3149_s3 + $0xa0] ss:$8 sps:$4 sm:$0xff]   ;;  %v2171_v1 = vld [vmem:[%s3149_s3 + $0xb4] ss:$8 sps:$4 sm:$0xff]   ;;  %v98_v4 = vpack.c.bf16 %v41_v62, %v40_v61 }
  0x12   :  { %1000 = vmatpush1.bf16.msra.mxu1 %v2142_v24  ;;  %v72_v2 = vld [vmem:[%s3146_s0 + $0x160] sm:$0xff]  ;;  %v73_v3 = vld [vmem:[%s3146_s0 + $0x168] sm:$0xff] }
  0x13   :  { %1001 = vmatprep.subr.bf16.mxu1 %v2147_v25 }
  0x16   :  { %1002 = vmatpush1.bf16.msra.mxu1 %v2145_v29 }
  0x17   :  { %1003 = vmatprep.subr.bf16.mxu1 %v2150_v30 }
  0x18   :  { %2049 = vmatmul.mubr.msk.bf16.gmra.mrb[8].mxu0 %vm142_vm1, %v94_v26  ;;  %2065 = vmatmul.mubr.msk.bf16.gmra.mrb[8].mxu1 %vm142_vm1, %v110_v31 }
  0x19   :  { %308 = vmatprep.mubr.bf16.mxu0 %v2224_v5  ;;  %468 = vmatprep.mubr.bf16.mxu1 %v2224_v5 }
  0x1a   :  { %1004 = vmatpush1.bf16.msra.mxu1 %v2148_v34 }
  0x1b   :  { %1005 = vmatprep.subr.bf16.mxu1 %v2153_v35 }
  0x1e   :  { %1006 = vmatpush1.bf16.msra.mxu1 %v2151_v39 }
  0x1f   :  { %1007 = vmatprep.subr.bf16.mxu1 %v2156_v40 }
  0x20   :  { %2050 = vmatmul.mubr.msk.bf16.gmra.mrb[12].mxu0 %vm142_vm1, %v95_v36  ;;  %2066 = vmatmul.mubr.msk.bf16.gmra.mrb[12].mxu1 %vm142_vm1, %v111_v41 }
  0x21   :  { %318 = vmatprep.mubr.bf16.mxu0 %v2224_v5  ;;  %478 = vmatprep.mubr.bf16.mxu1 %v2224_v5 }
  0x22   :  { %1008 = vmatpush1.bf16.msra.mxu1 %v2154_v44 }
  0x23   :  { %1009 = vmatprep.subr.bf16.mxu1 %v2159_v45 }
  0x26   :  { %1010 = vmatpush1.bf16.msra.mxu1 %v2157_v49 }
  0x27   :  { %1011 = vmatprep.subr.bf16.mxu1 %v2162_v50 }
  0x28   :  { %2051 = vmatmul.mubr.msk.bf16.gmra.mrb[16].mxu0 %vm142_vm1, %v96_v46  ;;  %2067 = vmatmul.mubr.msk.bf16.gmra.mrb[16].mxu1 %vm142_vm1, %v112_v52 }
  0x29   :  { %328 = vmatprep.mubr.bf16.mxu0 %v2224_v5  ;;  %488 = vmatprep.mubr.bf16.mxu1 %v2224_v5 }
  0x2a   :  { %1012 = vmatpush1.bf16.msra.mxu1 %v2160_v54 }
  0x2b   :  { %1013 = vmatprep.subr.bf16.mxu1 %v2165_v55 }
  0x2e   :  { %1014 = vmatpush1.bf16.msra.mxu1 %v2163_v59 }
  0x2f   :  { %1015 = vmatprep.subr.bf16.mxu1 %v2168_v60 }
  0x30   :  { %2052 = vmatmul.mubr.msk.bf16.gmra.mrb[20].mxu0 %vm142_vm1, %v97_v58  ;;  %2068 = vmatmul.mubr.msk.bf16.gmra.mrb[20].mxu1 %vm142_vm1, %v113_v63 }
  0x31   :  { %338 = vmatprep.mubr.bf16.mxu0 %v2224_v5  ;;  %498 = vmatprep.mubr.bf16.mxu1 %v2224_v5 }
  0x32   :  { %12 = vsyncpa [#allocation3], 0  ;;  %1016 = vmatpush1.bf16.msra.mxu1 %v2166_v0  ;;  %v2169_v6 = vld [vmem:[%s3149_s3 + $0xb0] ss:$8 sps:$4 sm:$0xff]   ;;  %v2174_v7 = vld [vmem:[%s3149_s3 + $0xc4] ss:$8 sps:$4 sm:$0xff]   ;;  %v114_v8 = vpack.c.bf16 %v73_v3, %v72_v2 }
  0x33   :  { %1017 = vmatprep.subr.bf16.mxu1 %v2171_v1  ;;  %v42_v9 = vld [vmem:[%s3146_s0 + $0x70] sm:$0xff]  ;;  %v43_v10 = vld [vmem:[%s3146_s0 + $0x78] sm:$0xff]  ;;  %v2172_v11 = vld [vmem:[%s3149_s3 + $0xc0] ss:$8 sps:$4 sm:$0xff]  }
  0x34   :  { %v2177_v12 = vld [vmem:[%s3149_s3 + $0xd4] ss:$8 sps:$4 sm:$0xff]   ;;  %v99_v13 = vpack.c.bf16 %v43_v10, %v42_v9  ;;  %v2175_v16 = vld [vmem:[%s3149_s3 + $0xd0] ss:$8 sps:$4 sm:$0xff]   ;;  %v2180_v17 = vld [vmem:[%s3149_s3 + $0xe4] ss:$8 sps:$4 sm:$0xff]  }
  0x35   :  { %v74_v14 = vld [vmem:[%s3146_s0 + $0x170] sm:$0xff]  ;;  %v75_v15 = vld [vmem:[%s3146_s0 + $0x178] sm:$0xff]  ;;  %v44_v19 = vld [vmem:[%s3146_s0 + $0x80] sm:$0xff] }
  0x36   :  { %1018 = vmatpush1.bf16.msra.mxu1 %v2169_v6  ;;  %v115_v18 = vpack.c.bf16 %v75_v15, %v74_v14  ;;  %v45_v20 = vld [vmem:[%s3146_s0 + $0x88] sm:$0xff]  ;;  %v76_v23 = vld [vmem:[%s3146_s0 + $0x180] sm:$0xff]  ;;  %v46_v26 = vld [vmem:[%s3146_s0 + $0x90] sm:$0xff] }
  0x37   :  { %1019 = vmatprep.subr.bf16.mxu1 %v2174_v7  ;;  %v2178_v21 = vld [vmem:[%s3149_s3 + $0xe0] ss:$8 sps:$4 sm:$0xff]   ;;  %v100_v22 = vpack.c.bf16 %v45_v20, %v44_v19  ;;  %v47_v27 = vld [vmem:[%s3146_s0 + $0x98] sm:$0xff]  ;;  %v78_v29 = vld [vmem:[%s3146_s0 + $0x190] sm:$0xff] }
  0x38   :  { %2053 = vmatmul.mubr.msk.bf16.gmra.mrb[24].mxu0 %vm142_vm1, %v98_v4  ;;  %2069 = vmatmul.mubr.msk.bf16.gmra.mrb[24].mxu1 %vm142_vm1, %v114_v8  ;;  %v77_v24 = vld [vmem:[%s3146_s0 + $0x188] sm:$0xff]  ;;  %v101_v28 = vpack.c.bf16 %v47_v27, %v46_v26  ;;  %v79_v30 = vld [vmem:[%s3146_s0 + $0x198] sm:$0xff]  ;;  %v48_v32 = vld [vmem:[%s3146_s0 + $0xa0] sm:$0xff]  ;;  %v127_v8 = vlaneseq }
  0x39   :  { %348 = vmatprep.mubr.bf16.mxu0 %v2224_v5  ;;  %508 = vmatprep.mubr.bf16.mxu1 %v2224_v5  ;;  %v116_v25 = vpack.c.bf16 %v77_v24, %v76_v23  ;;  %v117_v31 = vpack.c.bf16 %v79_v30, %v78_v29  ;;  %v49_v33 = vld [vmem:[%s3146_s0 + $0xa8] sm:$0xff]  ;;  %v80_v35 = vld [vmem:[%s3146_s0 + $0x1a0] sm:$0xff]  ;;  %v50_v38 = vld [vmem:[%s3146_s0 + $0xb0] sm:$0xff] }
  0x3a   :  { %1020 = vmatpush1.bf16.msra.mxu1 %v2172_v11  ;;  %v102_v34 = vpack.c.bf16 %v49_v33, %v48_v32  ;;  %v81_v36 = vld [vmem:[%s3146_s0 + $0x1a8] sm:$0xff]  ;;  %v51_v39 = vld [vmem:[%s3146_s0 + $0xb8] sm:$0xff]  ;;  %v82_v41 = vld [vmem:[%s3146_s0 + $0x1b0] sm:$0xff]  ;;  %v2631_v10 = vshrl.u32 %v127_v8, 7 }
  0x3b   :  { %1021 = vmatprep.subr.bf16.mxu1 %v2177_v12  ;;  %v118_v37 = vpack.c.bf16 %v81_v36, %v80_v35  ;;  %v103_v40 = vpack.c.bf16 %v51_v39, %v50_v38  ;;  %v83_v42 = vld [vmem:[%s3146_s0 + $0x1b8] sm:$0xff]  ;;  %v52_v45 = vld [vmem:[%s3146_s0 + $0xc0] sm:$0xff]  ;;  %v53_v46 = vld [vmem:[%s3146_s0 + $0xc8] sm:$0xff] }
  0x3c   :  { %v119_v43 = vpack.c.bf16 %v83_v42, %v82_v41  ;;  %v2183_v44 = vld [vmem:[%s3149_s3 + $0xf4] ss:$8 sps:$4 sm:$0xff]   ;;  %v2181_v47 = vld [vmem:[%s3149_s3 + $0xf0] ss:$8 sps:$4 sm:$0xff]   ;;  %v104_v48 = vpack.c.bf16 %v53_v46, %v52_v45  ;;  %v84_v49 = vld [vmem:[%s3146_s0 + $0x1c0] sm:$0xff]  ;;  %v129_v11 = vsub.s32 0, %v2631_v10 }
  0x3d   :  { %v85_v50 = vld [vmem:[%s3146_s0 + $0x1c8] sm:$0xff]  ;;  %v54_v52 = vld [vmem:[%s3146_s0 + $0xd0] sm:$0xff]  ;;  %v55_v53 = vld [vmem:[%s3146_s0 + $0xd8] sm:$0xff] }
  0x3e   :  { %1022 = vmatpush1.bf16.msra.mxu1 %v2175_v16  ;;  %v120_v51 = vpack.c.bf16 %v85_v50, %v84_v49  ;;  %v105_v54 = vpack.c.bf16 %v55_v53, %v54_v52  ;;  %v86_v55 = vld [vmem:[%s3146_s0 + $0x1d0] sm:$0xff]  ;;  %v87_v56 = vld [vmem:[%s3146_s0 + $0x1d8] sm:$0xff]  ;;  %v56_v58 = vld [vmem:[%s3146_s0 + $0xe0] sm:$0xff] }
  0x3f   :  { %1023 = vmatprep.subr.bf16.mxu1 %v2180_v17  ;;  %v121_v57 = vpack.c.bf16 %v87_v56, %v86_v55  ;;  %v57_v59 = vld [vmem:[%s3146_s0 + $0xe8] sm:$0xff]  ;;  %v88_v61 = vld [vmem:[%s3146_s0 + $0x1e0] sm:$0xff]  ;;  %v58_v0 = vld [vmem:[%s3146_s0 + $0xf0] sm:$0xff] }
  0x40   :  { %2054 = vmatmul.mubr.msk.bf16.gmra.mrb[28].mxu0 %vm142_vm1, %v99_v13  ;;  %2070 = vmatmul.mubr.msk.bf16.gmra.mrb[28].mxu1 %vm142_vm1, %v115_v18  ;;  %v106_v60 = vpack.c.bf16 %v57_v59, %v56_v58  ;;  %v89_v62 = vld [vmem:[%s3146_s0 + $0x1e8] sm:$0xff]  ;;  %v59_v1 = vld [vmem:[%s3146_s0 + $0xf8] sm:$0xff]  ;;  %v90_v3 = vld [vmem:[%s3146_s0 + $0x1f0] sm:$0xff]  ;;  %v133_v13 = vsub.s32 1, %v2631_v10 }
  0x41   :  { %358 = vmatprep.mubr.bf16.mxu0 %v2224_v5  ;;  %518 = vmatprep.mubr.bf16.mxu1 %v2224_v5  ;;  %v122_v63 = vpack.c.bf16 %v89_v62, %v88_v61  ;;  %v107_v2 = vpack.c.bf16 %v59_v1, %v58_v0  ;;  %v91_v4 = vld [vmem:[%s3146_s0 + $0x1f8] sm:$0xff]  ;;  %v2184_v7 = vld [vmem:[%s3151_s5] sm:$0xff]   ;;  %v2185_v9 = vld [vmem:[%s3151_s5 + $0x8] sm:$0xff]  }
  0x42   :  { %1024 = vmatpush1.bf16.msra.mxu1 %v2178_v21  ;;  %v123_v6 = vpack.c.bf16 %v91_v4, %v90_v3  ;;  %1676 = vmatpush1.bf16.msra.mxu0 %v2184_v7  ;;  %v125_v12 = vld [vmem:[%s3148_s2] sm:$0x3]  ;;  %v2186_v14 = vld [vmem:[%s3151_s5 + $0x10] sm:$0xff]   ;;  %v2187_v18 = vld [vmem:[%s3151_s5 + $0x18] sm:$0xff]  }
  0x43   :  { %1025 = vmatprep.subr.bf16.mxu1 %v2183_v44  ;;  %1677 = vmatprep.subr.bf16.mxu0 %v2224_v5  ;;  %v2644_v15 = vrot.slane %v125_v12, %v129_v11  ;;  %v2648_v16 = vrot.slane %v125_v12, %v133_v13  ;;  %v2188_v27 = vld [vmem:[%s3151_s5 + $0x20] sm:$0xff]   ;;  %v2189_v56 = vld [vmem:[%s3151_s5 + $0x28] sm:$0xff]  }
  0x46   :  { %1026 = vmatpush1.bf16.msra.mxu1 %v2181_v47  ;;  %1678 = vmatpush1.bf16.msra.mxu0 %v2185_v9 }
  0x47   :  { %1679 = vmatprep.subr.bf16.mxu0 %v2224_v5 }
  0x48   :  { %2055 = vmatmul.mubr.msk.bf16.gmra.mrb[32].mxu0 %vm142_vm1, %v100_v22  ;;  %2071 = vmatmul.mubr.msk.bf16.gmra.mrb[32].mxu1 %vm142_vm1, %v116_v25 }
  0x49   :  { %368 = vmatprep.mubr.bf16.mxu0 %v2224_v5  ;;  %528 = vmatprep.mubr.bf16.mxu1 %v2224_v5 }
  0x4a   :  { %1680 = vmatpush1.bf16.msra.mxu0 %v2186_v14 }
  0x4b   :  { %1681 = vmatprep.subr.bf16.mxu0 %v2224_v5 }
  0x4e   :  { %1682 = vmatpush1.bf16.msra.mxu0 %v2187_v18 }
  0x4f   :  { %1683 = vmatprep.subr.bf16.mxu0 %v2224_v5 }
  0x50   :  { %2056 = vmatmul.mubr.msk.bf16.gmra.mrb[36].mxu0 %vm142_vm1, %v101_v28  ;;  %2072 = vmatmul.mubr.msk.bf16.gmra.mrb[36].mxu1 %vm142_vm1, %v117_v31 }
  0x51   :  { %378 = vmatprep.mubr.bf16.mxu0 %v2224_v5  ;;  %538 = vmatprep.mubr.bf16.mxu1 %v2224_v5 }
  0x52   :  { %1684 = vmatpush1.bf16.msra.mxu0 %v2188_v27  ;;  %v2190_v27 = vld [vmem:[%s3151_s5 + $0x30] sm:$0xff]  }
  0x53   :  { %1685 = vmatprep.subr.bf16.mxu0 %v2224_v5 }
  0x56   :  { %1686 = vmatpush1.bf16.msra.mxu0 %v2189_v56 }
  0x57   :  { %1687 = vmatprep.subr.bf16.mxu0 %v2224_v5 }
  0x58   :  { %2057 = vmatmul.mubr.msk.bf16.gmra.mrb[40].mxu0 %vm142_vm1, %v102_v34  ;;  %2073 = vmatmul.mubr.msk.bf16.gmra.mrb[40].mxu1 %vm142_vm1, %v118_v37 }
  0x59   :  { %388 = vmatprep.mubr.bf16.mxu0 %v2224_v5  ;;  %548 = vmatprep.mubr.bf16.mxu1 %v2224_v5 }
  0x5a   :  { %1688 = vmatpush1.bf16.msra.mxu0 %v2190_v27 }
  0x5b   :  { %1689 = vmatprep.subr.bf16.mxu0 %v2224_v5 }
  0x60   :  { %2058 = vmatmul.mubr.msk.bf16.gmra.mrb[44].mxu0 %vm142_vm1, %v103_v40  ;;  %2074 = vmatmul.mubr.msk.bf16.gmra.mrb[44].mxu1 %vm142_vm1, %v119_v43 }
  0x61   :  { %398 = vmatprep.mubr.bf16.mxu0 %v2224_v5  ;;  %558 = vmatprep.mubr.bf16.mxu1 %v2224_v5 }
  0x68   :  { %2059 = vmatmul.mubr.msk.bf16.gmra.mrb[48].mxu0 %vm142_vm1, %v104_v48  ;;  %2075 = vmatmul.mubr.msk.bf16.gmra.mrb[48].mxu1 %vm142_vm1, %v120_v51 }
  0x69   :  { %408 = vmatprep.mubr.bf16.mxu0 %v2224_v5  ;;  %568 = vmatprep.mubr.bf16.mxu1 %v2224_v5 }
  0x70   :  { %2060 = vmatmul.mubr.msk.bf16.gmra.mrb[52].mxu0 %vm142_vm1, %v105_v54  ;;  %2076 = vmatmul.mubr.msk.bf16.gmra.mrb[52].mxu1 %vm142_vm1, %v121_v57 }
  0x71   :  { %418 = vmatprep.mubr.bf16.mxu0 %v2224_v5  ;;  %578 = vmatprep.mubr.bf16.mxu1 %v2224_v5 }
  0x78   :  { %2061 = vmatmul.mubr.msk.bf16.gmra.mrb[56].mxu0 %vm142_vm1, %v106_v60  ;;  %2077 = vmatmul.mubr.msk.bf16.gmra.mrb[56].mxu1 %vm142_vm1, %v122_v63 }
  0x79   :  { %428 = vmatprep.mubr.bf16.mxu0 %v2224_v5  ;;  %588 = vmatprep.mubr.bf16.mxu1 %v2224_v5 }
  0x80   :  { %2062 = vmatmul.mubr.msk.bf16.gmra.mrb[60].mxu0 %vm142_vm1, %v107_v2  ;;  %2078 = vmatmul.mubr.msk.bf16.gmra.mrb[60].mxu1 %vm142_vm1, %v123_v6 }
  0xdb   :  { %v280_v17 = vpop.f32.mrb[0].mxu0  ;;  %v440_v26 = vpop.f32.mrb[0].mxu1 }
  0xdc   :  { %v281_v19 = vadd.f32 %v280_v17, %v2644_v15  ;;  %v282_v20 = vpop.f32.mrb[1].mxu0  ;;  %v441_v30 = vadd.f32 %v440_v26, %v2644_v15  ;;  %v442_v31 = vpop.f32.mrb[1].mxu1 }
  0xdd   :  { %v283_v21 = vadd.f32 %v282_v20, %v2648_v16  ;;  %v284_v22 = vpop.f32.mrb[2].mxu0  ;;  %v443_v34 = vadd.f32 %v442_v31, %v2648_v16  ;;  %v444_v35 = vpop.f32.mrb[2].mxu1 }
  0xde   :  { %v285_v23 = vadd.f32 %v284_v22, %v2644_v15  ;;  %v286_v24 = vpop.f32.mrb[3].mxu0  ;;  %v599_v28 = vmax.f32 %v281_v19, 0.0  ;;  %v663_v37 = vmax.f32 %v441_v30, 0.0  ;;  %v445_v38 = vadd.f32 %v444_v35, %v2644_v15  ;;  %v446_v39 = vpop.f32.mrb[3].mxu1 }
  0xdf   :  { %v287_v25 = vadd.f32 %v286_v24, %v2648_v16  ;;  %v600_v32 = vmax.f32 %v283_v21, 0.0  ;;  %v664_v42 = vmax.f32 %v443_v34, 0.0  ;;  %v447_v43 = vadd.f32 %v446_v39, %v2648_v16 }
  0xe0   :  { %v601_v29 = vmax.f32 %v285_v23, 0.0  ;;  %v665_v46 = vmax.f32 %v445_v38, 0.0 }
  0xe1   :  { %v602_v33 = vmax.f32 %v287_v25, 0.0  ;;  %v666_v49 = vmax.f32 %v447_v43, 0.0 }
  0xe2   :  { %v727_v36 = vpack.c.bf16 %v601_v29, %v599_v28  ;;  %v2670_v52 = vpack.c.bf16 %v665_v46, %v663_v37 }
  0xe3   :  { %v728_v40 = vpack.c.bf16 %v602_v33, %v600_v32  ;;  %v290_v41 = vpop.f32.mrb[4].mxu0  ;;  %v2673_v54 = vpack.c.bf16 %v666_v49, %v664_v42  ;;  %v450_v55 = vpop.f32.mrb[4].mxu1 }
  0xe4   :  { %v291_v44 = vadd.f32 %v290_v41, %v2644_v15  ;;  %v292_v45 = vpop.f32.mrb[5].mxu0  ;;  %v451_v59 = vadd.f32 %v450_v55, %v2644_v15  ;;  %v452_v60 = vpop.f32.mrb[5].mxu1 }
  0xe5   :  { %v293_v47 = vadd.f32 %v292_v45, %v2648_v16  ;;  %v294_v48 = vpop.f32.mrb[6].mxu0  ;;  %1027 = vmatprep.mubr.bf16.mxu1 %v728_v40  ;;  %v453_v63 = vadd.f32 %v452_v60, %v2648_v16  ;;  %v454_v0 = vpop.f32.mrb[6].mxu1 }
  0xe6   :  { %v295_v50 = vadd.f32 %v294_v48, %v2644_v15  ;;  %v296_v51 = vpop.f32.mrb[7].mxu0  ;;  %1028 = vmatmul.mubr.bf16.vlgmr.msra.gmra.mrb[64].mxu1 %v727_v36  ;;  %v603_v57 = vmax.f32 %v291_v44, 0.0  ;;  %v667_v2 = vmax.f32 %v451_v59, 0.0  ;;  %v455_v3 = vadd.f32 %v454_v0, %v2644_v15  ;;  %v456_v4 = vpop.f32.mrb[7].mxu1 }
  0xe7   :  { %v297_v53 = vadd.f32 %v296_v51, %v2648_v16  ;;  %v604_v61 = vmax.f32 %v293_v47, 0.0  ;;  %v668_v8 = vmax.f32 %v453_v63, 0.0  ;;  %v457_v9 = vadd.f32 %v456_v4, %v2648_v16 }
  0xe8   :  { %v605_v58 = vmax.f32 %v295_v50, 0.0  ;;  %v669_v17 = vmax.f32 %v455_v3, 0.0 }
  0xe9   :  { %v606_v62 = vmax.f32 %v297_v53, 0.0  ;;  %v670_v20 = vmax.f32 %v457_v9, 0.0 }
  0xea   :  { %v729_v1 = vpack.c.bf16 %v605_v58, %v603_v57  ;;  %v2686_v23 = vpack.c.bf16 %v669_v17, %v667_v2  ;;  %v2191_v58 = vld [vmem:[%s3151_s5 + $0x38] sm:$0xff]  }
  0xeb   :  { %v730_v6 = vpack.c.bf16 %v606_v62, %v604_v61  ;;  %v300_v7 = vpop.f32.mrb[8].mxu0  ;;  %v2689_v25 = vpack.c.bf16 %v670_v20, %v668_v8  ;;  %v460_v26 = vpop.f32.mrb[8].mxu1  ;;  %1690 = vmatpush1.bf16.msra.mxu0 %v2191_v58 }
  0xec   :  { %v301_v12 = vadd.f32 %v300_v7, %v2644_v15  ;;  %v302_v14 = vpop.f32.mrb[9].mxu0  ;;  %v461_v30 = vadd.f32 %v460_v26, %v2644_v15  ;;  %v462_v31 = vpop.f32.mrb[9].mxu1  ;;  %1691 = vmatprep.subr.bf16.mxu0 %v2224_v5 }
  0xed   :  { %v303_v18 = vadd.f32 %v302_v14, %v2648_v16  ;;  %v304_v19 = vpop.f32.mrb[10].mxu0  ;;  %1037 = vmatprep.mubr.bf16.mxu1 %v730_v6  ;;  %v463_v34 = vadd.f32 %v462_v31, %v2648_v16  ;;  %v464_v35 = vpop.f32.mrb[10].mxu1  ;;  %v2192_v31 = vld [vmem:[%s3151_s5 + $0x40] sm:$0xff]  }
  0xee   :  { %v305_v21 = vadd.f32 %v304_v19, %v2644_v15  ;;  %v306_v22 = vpop.f32.mrb[11].mxu0  ;;  %1038 = vmatmul.mubr.bf16.gmra.mrb[68].mxu1 %v729_v1  ;;  %v607_v28 = vmax.f32 %v301_v12, 0.0  ;;  %v671_v37 = vmax.f32 %v461_v30, 0.0  ;;  %v465_v38 = vadd.f32 %v464_v35, %v2644_v15  ;;  %v466_v39 = vpop.f32.mrb[11].mxu1 }
  0xef   :  { %v307_v24 = vadd.f32 %v306_v22, %v2648_v16  ;;  %v608_v32 = vmax.f32 %v303_v18, 0.0  ;;  %v672_v42 = vmax.f32 %v463_v34, 0.0  ;;  %v467_v43 = vadd.f32 %v466_v39, %v2648_v16  ;;  %1692 = vmatpush1.bf16.msra.mxu0 %v2192_v31 }
  0xf0   :  { %v609_v29 = vmax.f32 %v305_v21, 0.0  ;;  %v673_v46 = vmax.f32 %v465_v38, 0.0  ;;  %1693 = vmatprep.subr.bf16.mxu0 %v2224_v5 }
  0xf1   :  { %v610_v33 = vmax.f32 %v307_v24, 0.0  ;;  %v674_v49 = vmax.f32 %v467_v43, 0.0 }
  0xf2   :  { %v731_v36 = vpack.c.bf16 %v609_v29, %v607_v28  ;;  %v2702_v53 = vpack.c.bf16 %v673_v46, %v671_v37 }
  0xf3   :  { %v732_v40 = vpack.c.bf16 %v610_v33, %v608_v32  ;;  %v310_v41 = vpop.f32.mrb[12].mxu0  ;;  %v2705_v56 = vpack.c.bf16 %v674_v49, %v672_v42  ;;  %v470_v57 = vpop.f32.mrb[12].mxu1 }
  0xf4   :  { %v311_v44 = vadd.f32 %v310_v41, %v2644_v15  ;;  %v312_v45 = vpop.f32.mrb[13].mxu0  ;;  %v471_v61 = vadd.f32 %v470_v57, %v2644_v15  ;;  %v472_v62 = vpop.f32.mrb[13].mxu1 }
  0xf5   :  { %v313_v47 = vadd.f32 %v312_v45, %v2648_v16  ;;  %v314_v48 = vpop.f32.mrb[14].mxu0  ;;  %1047 = vmatprep.mubr.bf16.mxu1 %v732_v40  ;;  %v473_v1 = vadd.f32 %v472_v62, %v2648_v16  ;;  %v474_v2 = vpop.f32.mrb[14].mxu1 }
  0xf6   :  { %v315_v50 = vadd.f32 %v314_v48, %v2644_v15  ;;  %v316_v51 = vpop.f32.mrb[15].mxu0  ;;  %1048 = vmatmul.mubr.bf16.gmra.mrb[72].mxu1 %v731_v36  ;;  %v611_v59 = vmax.f32 %v311_v44, 0.0  ;;  %v675_v4 = vmax.f32 %v471_v61, 0.0  ;;  %v475_v6 = vadd.f32 %v474_v2, %v2644_v15  ;;  %v476_v7 = vpop.f32.mrb[15].mxu1 }
  0xf7   :  { %v317_v55 = vadd.f32 %v316_v51, %v2648_v16  ;;  %v612_v63 = vmax.f32 %v313_v47, 0.0  ;;  %v676_v12 = vmax.f32 %v473_v1, 0.0  ;;  %v477_v14 = vadd.f32 %v476_v7, %v2648_v16 }
  0xf8   :  { %v613_v60 = vmax.f32 %v315_v50, 0.0  ;;  %v677_v19 = vmax.f32 %v475_v6, 0.0 }
  0xf9   :  { %v614_v0 = vmax.f32 %v317_v55, 0.0  ;;  %v678_v22 = vmax.f32 %v477_v14, 0.0 }
  0xfa   :  { %v733_v3 = vpack.c.bf16 %v613_v60, %v611_v59  ;;  %v2718_v27 = vpack.c.bf16 %v677_v19, %v675_v4 }
  0xfb   :  { %v734_v8 = vpack.c.bf16 %v614_v0, %v612_v63  ;;  %v320_v9 = vpop.f32.mrb[16].mxu0  ;;  %v2721_v29 = vpack.c.bf16 %v678_v22, %v676_v12  ;;  %v480_v30 = vpop.f32.mrb[16].mxu1  ;;  %v2193_v0 = vld [vmem:[%s3151_s5 + $0x48] sm:$0xff]  }
  0xfc   :  { %v321_v17 = vadd.f32 %v320_v9, %v2644_v15  ;;  %v322_v18 = vpop.f32.mrb[17].mxu0  ;;  %v481_v34 = vadd.f32 %v480_v30, %v2644_v15  ;;  %v482_v35 = vpop.f32.mrb[17].mxu1  ;;  %1694 = vmatpush1.bf16.msra.mxu0 %v2193_v0 }
  0xfd   :  { %v323_v20 = vadd.f32 %v322_v18, %v2648_v16  ;;  %v324_v21 = vpop.f32.mrb[18].mxu0  ;;  %1057 = vmatprep.mubr.bf16.mxu1 %v734_v8  ;;  %v483_v38 = vadd.f32 %v482_v35, %v2648_v16  ;;  %v484_v39 = vpop.f32.mrb[18].mxu1  ;;  %1695 = vmatprep.subr.bf16.mxu0 %v2224_v5 }
  0xfe   :  { %v325_v24 = vadd.f32 %v324_v21, %v2644_v15  ;;  %v326_v26 = vpop.f32.mrb[19].mxu0  ;;  %1058 = vmatmul.mubr.bf16.gmra.mrb[76].mxu1 %v733_v3  ;;  %v615_v32 = vmax.f32 %v321_v17, 0.0  ;;  %v679_v41 = vmax.f32 %v481_v34, 0.0  ;;  %v485_v42 = vadd.f32 %v484_v39, %v2644_v15  ;;  %v486_v43 = vpop.f32.mrb[19].mxu1  ;;  %v2194_v39 = vld [vmem:[%s3151_s5 + $0x50] sm:$0xff]  }
  0xff   :  { %v327_v28 = vadd.f32 %v326_v26, %v2648_v16  ;;  %v616_v36 = vmax.f32 %v323_v20, 0.0  ;;  %v680_v46 = vmax.f32 %v483_v38, 0.0  ;;  %v487_v47 = vadd.f32 %v486_v43, %v2648_v16 }
 0x100   :  { %v617_v33 = vmax.f32 %v325_v24, 0.0  ;;  %v681_v50 = vmax.f32 %v485_v42, 0.0  ;;  %1696 = vmatpush1.bf16.msra.mxu0 %v2194_v39 }
 0x101   :  { %v618_v37 = vmax.f32 %v327_v28, 0.0  ;;  %v682_v57 = vmax.f32 %v487_v47, 0.0  ;;  %1697 = vmatprep.subr.bf16.mxu0 %v2224_v5 }
 0x102   :  { %v735_v40 = vpack.c.bf16 %v617_v33, %v615_v32  ;;  %v2734_v60 = vpack.c.bf16 %v681_v50, %v679_v41 }
 0x103   :  { %v736_v44 = vpack.c.bf16 %v618_v37, %v616_v36  ;;  %v330_v45 = vpop.f32.mrb[20].mxu0  ;;  %v2737_v62 = vpack.c.bf16 %v682_v57, %v680_v46  ;;  %v490_v63 = vpop.f32.mrb[20].mxu1 }
 0x104   :  { %v331_v48 = vadd.f32 %v330_v45, %v2644_v15  ;;  %v332_v49 = vpop.f32.mrb[21].mxu0  ;;  %v491_v3 = vadd.f32 %v490_v63, %v2644_v15  ;;  %v492_v4 = vpop.f32.mrb[21].mxu1 }
 0x105   :  { %v333_v51 = vadd.f32 %v332_v49, %v2648_v16  ;;  %v334_v55 = vpop.f32.mrb[22].mxu0  ;;  %1067 = vmatprep.mubr.bf16.mxu1 %v736_v44  ;;  %v493_v8 = vadd.f32 %v492_v4, %v2648_v16  ;;  %v494_v9 = vpop.f32.mrb[22].mxu1 }
 0x106   :  { %v335_v58 = vadd.f32 %v334_v55, %v2644_v15  ;;  %v336_v59 = vpop.f32.mrb[23].mxu0  ;;  %1068 = vmatmul.mubr.bf16.gmra.mrb[80].mxu1 %v735_v40  ;;  %v619_v1 = vmax.f32 %v331_v48, 0.0  ;;  %v683_v14 = vmax.f32 %v491_v3, 0.0  ;;  %v495_v17 = vadd.f32 %v494_v9, %v2644_v15  ;;  %v496_v18 = vpop.f32.mrb[23].mxu1 }
 0x107   :  { %v337_v61 = vadd.f32 %v336_v59, %v2648_v16  ;;  %v620_v6 = vmax.f32 %v333_v51, 0.0  ;;  %v684_v21 = vmax.f32 %v493_v8, 0.0  ;;  %v497_v22 = vadd.f32 %v496_v18, %v2648_v16 }
 0x108   :  { %v621_v2 = vmax.f32 %v335_v58, 0.0  ;;  %v685_v28 = vmax.f32 %v495_v17, 0.0 }
 0x109   :  { %v622_v7 = vmax.f32 %v337_v61, 0.0  ;;  %v686_v32 = vmax.f32 %v497_v22, 0.0 }
 0x10a   :  { %v737_v12 = vpack.c.bf16 %v621_v2, %v619_v1  ;;  %v2750_v35 = vpack.c.bf16 %v685_v28, %v683_v14  ;;  %v2195_v14 = vld [vmem:[%s3151_s5 + $0x58] sm:$0xff]  }
 0x10b   :  { %v738_v19 = vpack.c.bf16 %v622_v7, %v620_v6  ;;  %v340_v20 = vpop.f32.mrb[24].mxu0  ;;  %v2753_v37 = vpack.c.bf16 %v686_v32, %v684_v21  ;;  %v500_v38 = vpop.f32.mrb[24].mxu1  ;;  %1698 = vmatpush1.bf16.msra.mxu0 %v2195_v14 }
 0x10c   :  { %v341_v24 = vadd.f32 %v340_v20, %v2644_v15  ;;  %v342_v26 = vpop.f32.mrb[25].mxu0  ;;  %v501_v42 = vadd.f32 %v500_v38, %v2644_v15  ;;  %v502_v43 = vpop.f32.mrb[25].mxu1  ;;  %1699 = vmatprep.subr.bf16.mxu0 %v2224_v5 }
 0x10d   :  { %v343_v30 = vadd.f32 %v342_v26, %v2648_v16  ;;  %v344_v31 = vpop.f32.mrb[26].mxu0  ;;  %1077 = vmatprep.mubr.bf16.mxu1 %v738_v19  ;;  %v503_v46 = vadd.f32 %v502_v43, %v2648_v16  ;;  %v504_v47 = vpop.f32.mrb[26].mxu1 }
 0x10e   :  { %v345_v33 = vadd.f32 %v344_v31, %v2644_v15  ;;  %v346_v34 = vpop.f32.mrb[27].mxu0  ;;  %1078 = vmatmul.mubr.bf16.gmra.mrb[84].mxu1 %v737_v12  ;;  %v623_v40 = vmax.f32 %v341_v24, 0.0  ;;  %v687_v49 = vmax.f32 %v501_v42, 0.0  ;;  %v505_v50 = vadd.f32 %v504_v47, %v2644_v15  ;;  %v506_v51 = vpop.f32.mrb[27].mxu1 }
 0x10f   :  { %v347_v36 = vadd.f32 %v346_v34, %v2648_v16  ;;  %v624_v44 = vmax.f32 %v343_v30, 0.0  ;;  %v688_v58 = vmax.f32 %v503_v46, 0.0  ;;  %v507_v59 = vadd.f32 %v506_v51, %v2648_v16  ;;  %v2196_v51 = vld [vmem:[%s3151_s5 + $0x60] sm:$0xff]  }
 0x110   :  { %v625_v41 = vmax.f32 %v345_v33, 0.0  ;;  %v689_v0 = vmax.f32 %v505_v50, 0.0  ;;  %1700 = vmatpush1.bf16.msra.mxu0 %v2196_v51 }
 0x111   :  { %v626_v45 = vmax.f32 %v347_v36, 0.0  ;;  %v690_v3 = vmax.f32 %v507_v59, 0.0  ;;  %1701 = vmatprep.subr.bf16.mxu0 %v2224_v5 }
 0x112   :  { %v739_v48 = vpack.c.bf16 %v625_v41, %v623_v40  ;;  %v2766_v7 = vpack.c.bf16 %v689_v0, %v687_v49 }
 0x113   :  { %v740_v55 = vpack.c.bf16 %v626_v45, %v624_v44  ;;  %v350_v57 = vpop.f32.mrb[28].mxu0  ;;  %v2769_v9 = vpack.c.bf16 %v690_v3, %v688_v58  ;;  %v510_v12 = vpop.f32.mrb[28].mxu1 }
 0x114   :  { %v351_v61 = vadd.f32 %v350_v57, %v2644_v15  ;;  %v352_v63 = vpop.f32.mrb[29].mxu0  ;;  %v511_v19 = vadd.f32 %v510_v12, %v2644_v15  ;;  %v512_v20 = vpop.f32.mrb[29].mxu1 }
 0x115   :  { %v353_v1 = vadd.f32 %v352_v63, %v2648_v16  ;;  %v354_v2 = vpop.f32.mrb[30].mxu0  ;;  %1087 = vmatprep.mubr.bf16.mxu1 %v740_v55  ;;  %v513_v24 = vadd.f32 %v512_v20, %v2648_v16  ;;  %v514_v26 = vpop.f32.mrb[30].mxu1 }
 0x116   :  { %v355_v4 = vadd.f32 %v354_v2, %v2644_v15  ;;  %v356_v6 = vpop.f32.mrb[31].mxu0  ;;  %1088 = vmatmul.mubr.bf16.gmra.mrb[88].mxu1 %v739_v48  ;;  %v627_v17 = vmax.f32 %v351_v61, 0.0  ;;  %v691_v30 = vmax.f32 %v511_v19, 0.0  ;;  %v515_v31 = vadd.f32 %v514_v26, %v2644_v15  ;;  %v516_v32 = vpop.f32.mrb[31].mxu1 }
 0x117   :  { %v357_v8 = vadd.f32 %v356_v6, %v2648_v16  ;;  %v628_v21 = vmax.f32 %v353_v1, 0.0  ;;  %v692_v36 = vmax.f32 %v513_v24, 0.0  ;;  %v517_v38 = vadd.f32 %v516_v32, %v2648_v16 }
 0x118   :  { %v629_v18 = vmax.f32 %v355_v4, 0.0  ;;  %v693_v41 = vmax.f32 %v515_v31, 0.0 }
 0x119   :  { %v630_v22 = vmax.f32 %v357_v8, 0.0  ;;  %v694_v44 = vmax.f32 %v517_v38, 0.0 }
 0x11a   :  { %v741_v28 = vpack.c.bf16 %v629_v18, %v627_v17  ;;  %v2782_v47 = vpack.c.bf16 %v693_v41, %v691_v30 }
 0x11b   :  { %v742_v33 = vpack.c.bf16 %v630_v22, %v628_v21  ;;  %v360_v34 = vpop.f32.mrb[32].mxu0  ;;  %v2785_v49 = vpack.c.bf16 %v694_v44, %v692_v36  ;;  %v520_v50 = vpop.f32.mrb[32].mxu1 }
 0x11c   :  { %v361_v39 = vadd.f32 %v360_v34, %v2644_v15  ;;  %v362_v40 = vpop.f32.mrb[33].mxu0  ;;  %v521_v58 = vadd.f32 %v520_v50, %v2644_v15  ;;  %v522_v59 = vpop.f32.mrb[33].mxu1  ;;  %v2197_v34 = vld [vmem:[%s3151_s5 + $0x68] sm:$0xff]  }
 0x11d   :  { %v363_v42 = vadd.f32 %v362_v40, %v2648_v16  ;;  %v364_v43 = vpop.f32.mrb[34].mxu0  ;;  %1097 = vmatprep.mubr.bf16.mxu1 %v742_v33  ;;  %v523_v0 = vadd.f32 %v522_v59, %v2648_v16  ;;  %v524_v1 = vpop.f32.mrb[34].mxu1  ;;  %1702 = vmatpush1.bf16.msra.mxu0 %v2197_v34 }
 0x11e   :  { %v365_v45 = vadd.f32 %v364_v43, %v2644_v15  ;;  %v366_v46 = vpop.f32.mrb[35].mxu0  ;;  %1098 = vmatmul.mubr.bf16.gmra.mrb[92].mxu1 %v741_v28  ;;  %v631_v55 = vmax.f32 %v361_v39, 0.0  ;;  %v695_v3 = vmax.f32 %v521_v58, 0.0  ;;  %v525_v4 = vadd.f32 %v524_v1, %v2644_v15  ;;  %v526_v6 = vpop.f32.mrb[35].mxu1  ;;  %1703 = vmatprep.subr.bf16.mxu0 %v2224_v5 }
 0x11f   :  { %v367_v48 = vadd.f32 %v366_v46, %v2648_v16  ;;  %v632_v61 = vmax.f32 %v363_v42, 0.0  ;;  %v696_v14 = vmax.f32 %v523_v0, 0.0  ;;  %v527_v17 = vadd.f32 %v526_v6, %v2648_v16 }
 0x120   :  { %v633_v57 = vmax.f32 %v365_v45, 0.0  ;;  %v697_v20 = vmax.f32 %v525_v4, 0.0 }
 0x121   :  { %v634_v63 = vmax.f32 %v367_v48, 0.0  ;;  %v698_v24 = vmax.f32 %v527_v17, 0.0  ;;  %v2198_v17 = vld [vmem:[%s3151_s5 + $0x70] sm:$0xff]  }
 0x122   :  { %v743_v2 = vpack.c.bf16 %v633_v57, %v631_v55  ;;  %v2798_v30 = vpack.c.bf16 %v697_v20, %v695_v3  ;;  %1704 = vmatpush1.bf16.msra.mxu0 %v2198_v17 }
 0x123   :  { %v744_v8 = vpack.c.bf16 %v634_v63, %v632_v61  ;;  %v370_v12 = vpop.f32.mrb[36].mxu0  ;;  %v2801_v32 = vpack.c.bf16 %v698_v24, %v696_v14  ;;  %v530_v33 = vpop.f32.mrb[36].mxu1  ;;  %1705 = vmatprep.subr.bf16.mxu0 %v2224_v5 }
 0x124   :  { %v371_v18 = vadd.f32 %v370_v12, %v2644_v15  ;;  %v372_v19 = vpop.f32.mrb[37].mxu0  ;;  %v531_v39 = vadd.f32 %v530_v33, %v2644_v15  ;;  %v532_v40 = vpop.f32.mrb[37].mxu1 }
 0x125   :  { %v373_v21 = vadd.f32 %v372_v19, %v2648_v16  ;;  %v374_v22 = vpop.f32.mrb[38].mxu0  ;;  %1107 = vmatprep.mubr.bf16.mxu1 %v744_v8  ;;  %v533_v43 = vadd.f32 %v532_v40, %v2648_v16  ;;  %v534_v44 = vpop.f32.mrb[38].mxu1 }
 0x126   :  { %v375_v26 = vadd.f32 %v374_v22, %v2644_v15  ;;  %v376_v28 = vpop.f32.mrb[39].mxu0  ;;  %1108 = vmatmul.mubr.bf16.gmra.mrb[96].mxu1 %v743_v2  ;;  %v635_v36 = vmax.f32 %v371_v18, 0.0  ;;  %v699_v46 = vmax.f32 %v531_v39, 0.0  ;;  %v535_v48 = vadd.f32 %v534_v44, %v2644_v15  ;;  %v536_v50 = vpop.f32.mrb[39].mxu1 }
 0x127   :  { %v377_v31 = vadd.f32 %v376_v28, %v2648_v16  ;;  %v636_v41 = vmax.f32 %v373_v21, 0.0  ;;  %v700_v57 = vmax.f32 %v533_v43, 0.0  ;;  %v537_v58 = vadd.f32 %v536_v50, %v2648_v16 }
 0x128   :  { %v637_v38 = vmax.f32 %v375_v26, 0.0  ;;  %v701_v63 = vmax.f32 %v535_v48, 0.0 }
 0x129   :  { %v638_v42 = vmax.f32 %v377_v31, 0.0  ;;  %v702_v2 = vmax.f32 %v537_v58, 0.0 }
 0x12a   :  { %v745_v45 = vpack.c.bf16 %v637_v38, %v635_v36  ;;  %v2814_v6 = vpack.c.bf16 %v701_v63, %v699_v46 }
 0x12b   :  { %v746_v51 = vpack.c.bf16 %v638_v42, %v636_v41  ;;  %v380_v55 = vpop.f32.mrb[40].mxu0  ;;  %v2817_v12 = vpack.c.bf16 %v702_v2, %v700_v57  ;;  %v540_v14 = vpop.f32.mrb[40].mxu1 }
 0x12c   :  { %v381_v59 = vadd.f32 %v380_v55, %v2644_v15  ;;  %v382_v61 = vpop.f32.mrb[41].mxu0  ;;  %v541_v20 = vadd.f32 %v540_v14, %v2644_v15  ;;  %v542_v21 = vpop.f32.mrb[41].mxu1 }
 0x12d   :  { %v383_v0 = vadd.f32 %v382_v61, %v2648_v16  ;;  %v384_v1 = vpop.f32.mrb[42].mxu0  ;;  %1117 = vmatprep.mubr.bf16.mxu1 %v746_v51  ;;  %v543_v26 = vadd.f32 %v542_v21, %v2648_v16  ;;  %v544_v28 = vpop.f32.mrb[42].mxu1 }
 0x12e   :  { %v385_v3 = vadd.f32 %v384_v1, %v2644_v15  ;;  %v386_v4 = vpop.f32.mrb[43].mxu0  ;;  %1118 = vmatmul.mubr.bf16.gmra.mrb[100].mxu1 %v745_v45  ;;  %v639_v18 = vmax.f32 %v381_v59, 0.0  ;;  %v703_v33 = vmax.f32 %v541_v20, 0.0  ;;  %v545_v34 = vadd.f32 %v544_v28, %v2644_v15  ;;  %v546_v36 = vpop.f32.mrb[43].mxu1 }
 0x12f   :  { %v387_v8 = vadd.f32 %v386_v4, %v2648_v16  ;;  %v640_v22 = vmax.f32 %v383_v0, 0.0  ;;  %v704_v40 = vmax.f32 %v543_v26, 0.0  ;;  %v547_v41 = vadd.f32 %v546_v36, %v2648_v16 }
 0x130   :  { %v641_v19 = vmax.f32 %v385_v3, 0.0  ;;  %v705_v44 = vmax.f32 %v545_v34, 0.0 }
 0x131   :  { %v642_v24 = vmax.f32 %v387_v8, 0.0  ;;  %v706_v48 = vmax.f32 %v547_v41, 0.0 }
 0x132   :  { %v747_v31 = vpack.c.bf16 %v641_v19, %v639_v18  ;;  %v2830_v55 = vpack.c.bf16 %v705_v44, %v703_v33 }
 0x133   :  { %v748_v38 = vpack.c.bf16 %v642_v24, %v640_v22  ;;  %v390_v39 = vpop.f32.mrb[44].mxu0  ;;  %v2833_v57 = vpack.c.bf16 %v706_v48, %v704_v40  ;;  %v550_v58 = vpop.f32.mrb[44].mxu1 }
 0x134   :  { %v391_v42 = vadd.f32 %v390_v39, %v2644_v15  ;;  %v392_v43 = vpop.f32.mrb[45].mxu0  ;;  %v551_v63 = vadd.f32 %v550_v58, %v2644_v15  ;;  %v552_v0 = vpop.f32.mrb[45].mxu1 }
 0x135   :  { %v393_v45 = vadd.f32 %v392_v43, %v2648_v16  ;;  %v394_v46 = vpop.f32.mrb[46].mxu0  ;;  %1127 = vmatprep.mubr.bf16.mxu1 %v748_v38  ;;  %v553_v3 = vadd.f32 %v552_v0, %v2648_v16  ;;  %v554_v4 = vpop.f32.mrb[46].mxu1  ;;  %v2199_v43 = vld [vmem:[%s3151_s5 + $0x78] sm:$0xff]  }
 0x136   :  { %v395_v50 = vadd.f32 %v394_v46, %v2644_v15  ;;  %v396_v51 = vpop.f32.mrb[47].mxu0  ;;  %1128 = vmatmul.mubr.bf16.gmra.mrb[104].mxu1 %v747_v31  ;;  %v643_v59 = vmax.f32 %v391_v42, 0.0  ;;  %v707_v14 = vmax.f32 %v551_v63, 0.0  ;;  %v555_v17 = vadd.f32 %v554_v4, %v2644_v15  ;;  %v556_v18 = vpop.f32.mrb[47].mxu1  ;;  %1706 = vmatpush1.bf16.msra.mxu0 %v2199_v43 }
 0x137   :  { %v397_v5 = vadd.f32 %v396_v51, %v2648_v16  ;;  %v644_v1 = vmax.f32 %v393_v45, 0.0  ;;  %v708_v21 = vmax.f32 %v553_v3, 0.0  ;;  %v557_v22 = vadd.f32 %v556_v18, %v2648_v16 }
 0x138   :  { %v645_v61 = vmax.f32 %v395_v50, 0.0  ;;  %v709_v28 = vmax.f32 %v555_v17, 0.0 }
 0x139   :  { %v646_v2 = vmax.f32 %v397_v5, 0.0  ;;  %v710_v34 = vmax.f32 %v557_v22, 0.0 }
 0x13a   :  { %v749_v8 = vpack.c.bf16 %v645_v61, %v643_v59  ;;  %v2842_v39 = vpack.c.bf16 %v709_v28, %v707_v14 }
 0x13b   :  { %v750_v19 = vpack.c.bf16 %v646_v2, %v644_v1  ;;  %v400_v20 = vpop.f32.mrb[48].mxu0  ;;  %v2845_v41 = vpack.c.bf16 %v710_v34, %v708_v21  ;;  %v560_v42 = vpop.f32.mrb[48].mxu1 }
 0x13c   :  { %v401_v24 = vadd.f32 %v400_v20, %v2644_v15  ;;  %v402_v26 = vpop.f32.mrb[49].mxu0  ;;  %v561_v46 = vadd.f32 %v560_v42, %v2644_v15  ;;  %v562_v48 = vpop.f32.mrb[49].mxu1 }
 0x13d   :  { %v403_v31 = vadd.f32 %v402_v26, %v2648_v16  ;;  %v404_v33 = vpop.f32.mrb[50].mxu0  ;;  %1137 = vmatprep.mubr.bf16.mxu1 %v750_v19  ;;  %v563_v5 = vadd.f32 %v562_v48, %v2648_v16  ;;  %v564_v58 = vpop.f32.mrb[50].mxu1 }
 0x13e   :  { %v405_v36 = vadd.f32 %v404_v33, %v2644_v15  ;;  %v406_v38 = vpop.f32.mrb[51].mxu0  ;;  %1138 = vmatmul.mubr.bf16.gmra.mrb[108].mxu1 %v749_v8  ;;  %v647_v44 = vmax.f32 %v401_v24, 0.0  ;;  %v711_v61 = vmax.f32 %v561_v46, 0.0  ;;  %v565_v63 = vadd.f32 %v564_v58, %v2644_v15  ;;  %v566_v0 = vpop.f32.mrb[51].mxu1 }
 0x13f   :  { %v407_v40 = vadd.f32 %v406_v38, %v2648_v16  ;;  %v648_v50 = vmax.f32 %v403_v31, 0.0  ;;  %v712_v3 = vmax.f32 %v563_v5, 0.0  ;;  %v567_v4 = vadd.f32 %v566_v0, %v2648_v16 }
 0x140   :  { %v649_v45 = vmax.f32 %v405_v36, 0.0  ;;  %v713_v17 = vmax.f32 %v565_v63, 0.0 }
 0x141   :  { %v650_v51 = vmax.f32 %v407_v40, 0.0  ;;  %v714_v20 = vmax.f32 %v567_v4, 0.0 }
 0x142   :  { %v751_v59 = vpack.c.bf16 %v649_v45, %v647_v44  ;;  %v2857_v24 = vpack.c.bf16 %v713_v17, %v711_v61 }
 0x143   :  { %v752_v1 = vpack.c.bf16 %v650_v51, %v648_v50  ;;  %v410_v2 = vpop.f32.mrb[52].mxu0  ;;  %v2860_v28 = vpack.c.bf16 %v714_v20, %v712_v3  ;;  %v570_v31 = vpop.f32.mrb[52].mxu1 }
 0x144   :  { %v411_v8 = vadd.f32 %v410_v2, %v2644_v15  ;;  %v412_v14 = vpop.f32.mrb[53].mxu0  ;;  %v571_v36 = vadd.f32 %v570_v31, %v2644_v15  ;;  %v572_v38 = vpop.f32.mrb[53].mxu1 }
 0x145   :  { %v413_v18 = vadd.f32 %v412_v14, %v2648_v16  ;;  %v414_v19 = vpop.f32.mrb[54].mxu0  ;;  %1147 = vmatprep.mubr.bf16.mxu1 %v752_v1  ;;  %v573_v43 = vadd.f32 %v572_v38, %v2648_v16  ;;  %v574_v44 = vpop.f32.mrb[54].mxu1 }
 0x146   :  { %v415_v21 = vadd.f32 %v414_v19, %v2644_v15  ;;  %v416_v22 = vpop.f32.mrb[55].mxu0  ;;  %1148 = vmatmul.mubr.bf16.gmra.mrb[112].mxu1 %v751_v59  ;;  %v651_v33 = vmax.f32 %v411_v8, 0.0  ;;  %v715_v46 = vmax.f32 %v571_v36, 0.0  ;;  %v575_v48 = vadd.f32 %v574_v44, %v2644_v15  ;;  %v576_v50 = vpop.f32.mrb[55].mxu1 }
 0x147   :  { %v417_v26 = vadd.f32 %v416_v22, %v2648_v16  ;;  %v652_v40 = vmax.f32 %v413_v18, 0.0  ;;  %v716_v58 = vmax.f32 %v573_v43, 0.0  ;;  %v577_v59 = vadd.f32 %v576_v50, %v2648_v16 }
 0x148   :  { %v653_v34 = vmax.f32 %v415_v21, 0.0  ;;  %v717_v0 = vmax.f32 %v575_v48, 0.0 }
 0x149   :  { %v654_v42 = vmax.f32 %v417_v26, 0.0  ;;  %v718_v3 = vmax.f32 %v577_v59, 0.0 }
 0x14a   :  { %v753_v45 = vpack.c.bf16 %v653_v34, %v651_v33  ;;  %v2869_v14 = vpack.c.bf16 %v717_v0, %v715_v46 }
 0x14b   :  { %v754_v51 = vpack.c.bf16 %v654_v42, %v652_v40  ;;  %v420_v5 = vpop.f32.mrb[56].mxu0  ;;  %v2872_v18 = vpack.c.bf16 %v718_v3, %v716_v58  ;;  %v580_v19 = vpop.f32.mrb[56].mxu1 }
 0x14c   :  { %v421_v61 = vadd.f32 %v420_v5, %v2644_v15  ;;  %v422_v63 = vpop.f32.mrb[57].mxu0  ;;  %v581_v22 = vadd.f32 %v580_v19, %v2644_v15  ;;  %v582_v26 = vpop.f32.mrb[57].mxu1 }
 0x14d   :  { %v423_v1 = vadd.f32 %v422_v63, %v2648_v16  ;;  %v424_v2 = vpop.f32.mrb[58].mxu0  ;;  %1157 = vmatprep.mubr.bf16.mxu1 %v754_v51  ;;  %v583_v34 = vadd.f32 %v582_v26, %v2648_v16  ;;  %v584_v36 = vpop.f32.mrb[58].mxu1 }
 0x14e   :  { %v425_v4 = vadd.f32 %v424_v2, %v2644_v15  ;;  %v426_v8 = vpop.f32.mrb[59].mxu0  ;;  %1158 = vmatmul.mubr.bf16.gmra.mrb[116].mxu1 %v753_v45  ;;  %v655_v20 = vmax.f32 %v421_v61, 0.0  ;;  %v719_v40 = vmax.f32 %v581_v22, 0.0  ;;  %v585_v42 = vadd.f32 %v584_v36, %v2644_v15  ;;  %v586_v43 = vpop.f32.mrb[59].mxu1 }
 0x14f   :  { %v427_v17 = vadd.f32 %v426_v8, %v2648_v16  ;;  %v656_v31 = vmax.f32 %v423_v1, 0.0  ;;  %v720_v46 = vmax.f32 %v583_v34, 0.0  ;;  %v587_v48 = vadd.f32 %v586_v43, %v2648_v16 }
 0x150   :  { %v657_v21 = vmax.f32 %v425_v4, 0.0  ;;  %v721_v5 = vmax.f32 %v585_v42, 0.0 }
 0x151   :  { %v658_v33 = vmax.f32 %v427_v17, 0.0  ;;  %v722_v61 = vmax.f32 %v587_v48, 0.0 }
 0x152   :  { %v755_v38 = vpack.c.bf16 %v657_v21, %v655_v20  ;;  %v2881_v1 = vpack.c.bf16 %v721_v5, %v719_v40 }
 0x153   :  { %v756_v44 = vpack.c.bf16 %v658_v33, %v656_v31  ;;  %v430_v45 = vpop.f32.mrb[60].mxu0  ;;  %v2884_v3 = vpack.c.bf16 %v722_v61, %v720_v46  ;;  %v590_v4 = vpop.f32.mrb[60].mxu1 }
 0x154   :  { %v431_v50 = vadd.f32 %v430_v45, %v2644_v15  ;;  %v432_v51 = vpop.f32.mrb[61].mxu0  ;;  %v591_v19 = vadd.f32 %v590_v4, %v2644_v15  ;;  %v592_v20 = vpop.f32.mrb[61].mxu1 }
 0x155   :  { %v433_v58 = vadd.f32 %v432_v51, %v2648_v16  ;;  %v434_v59 = vpop.f32.mrb[62].mxu0  ;;  %1167 = vmatprep.mubr.bf16.mxu1 %v756_v44  ;;  %v593_v26 = vadd.f32 %v592_v20, %v2648_v16  ;;  %v594_v31 = vpop.f32.mrb[62].mxu1 }
 0x156   :  { %v435_v63 = vadd.f32 %v434_v59, %v2644_v15  ;;  %v436_v0 = vpop.f32.mrb[63].mxu0  ;;  %1168 = vmatmul.mubr.bf16.gmra.mrb[120].mxu1 %v755_v38  ;;  %v659_v8 = vmax.f32 %v431_v50, 0.0  ;;  %v723_v34 = vmax.f32 %v591_v19, 0.0  ;;  %v595_v36 = vadd.f32 %v594_v31, %v2644_v15  ;;  %v596_v38 = vpop.f32.mrb[63].mxu1  ;;  %v823_v15 = vld [vmem:[%s3150_s4] sm:$0x3] }
 0x157   :  { %v437_v2 = vadd.f32 %v436_v0, %v2648_v16  ;;  %v660_v21 = vmax.f32 %v433_v58, 0.0  ;;  %v724_v42 = vmax.f32 %v593_v26, 0.0  ;;  %v597_v43 = vadd.f32 %v596_v38, %v2648_v16 }
 0x158   :  { %v661_v17 = vmax.f32 %v435_v63, 0.0  ;;  %v725_v44 = vmax.f32 %v595_v36, 0.0  ;;  %v2921_v16 = vrot.slane %v823_v15, %v129_v11 }
 0x159   :  { %v662_v22 = vmax.f32 %v437_v2, 0.0  ;;  %v726_v45 = vmax.f32 %v597_v43, 0.0 }
 0x15a   :  { %v757_v33 = vpack.c.bf16 %v661_v17, %v659_v8  ;;  %v2890_v46 = vpack.c.bf16 %v725_v44, %v723_v34 }
 0x15b   :  { %v758_v40 = vpack.c.bf16 %v662_v22, %v660_v21  ;;  %v2893_v48 = vpack.c.bf16 %v726_v45, %v724_v42 }
 0x15d   :  { %1177 = vmatprep.mubr.bf16.mxu1 %v758_v40 }
 0x15e   :  { %1178 = vmatmul.mubr.bf16.gmra.mrb[124].mxu1 %v757_v33 }
 0x15f   :  { %1187 = vmatprep.mubr.bf16.mxu1 %v2673_v54 }
 0x166   :  { %1188 = vmatmul.mubr.bf16.gmra.mrb[128].mxu1 %v2670_v52  ;;  %v2926_v52 = vrot.slane %v823_v15, %v133_v13 }
 0x167   :  { %1197 = vmatprep.mubr.bf16.mxu1 %v2689_v25 }
 0x16e   :  { %1198 = vmatmul.mubr.bf16.gmra.mrb[132].mxu1 %v2686_v23 }
 0x16f   :  { %1207 = vmatprep.mubr.bf16.mxu1 %v2705_v56 }
 0x176   :  { %1208 = vmatmul.mubr.bf16.gmra.mrb[136].mxu1 %v2702_v53 }
 0x177   :  { %1217 = vmatprep.mubr.bf16.mxu1 %v2721_v29 }
 0x17e   :  { %1218 = vmatmul.mubr.bf16.gmra.mrb[140].mxu1 %v2718_v27 }
 0x17f   :  { %1227 = vmatprep.mubr.bf16.mxu1 %v2737_v62 }
 0x186   :  { %1228 = vmatmul.mubr.bf16.gmra.mrb[144].mxu1 %v2734_v60 }
 0x187   :  { %1237 = vmatprep.mubr.bf16.mxu1 %v2753_v37 }
 0x18e   :  { %1238 = vmatmul.mubr.bf16.gmra.mrb[148].mxu1 %v2750_v35 }
 0x18f   :  { %1247 = vmatprep.mubr.bf16.mxu1 %v2769_v9 }
 0x196   :  { %1248 = vmatmul.mubr.bf16.gmra.mrb[152].mxu1 %v2766_v7 }
 0x197   :  { %1257 = vmatprep.mubr.bf16.mxu1 %v2785_v49 }
 0x19e   :  { %1258 = vmatmul.mubr.bf16.gmra.mrb[156].mxu1 %v2782_v47 }
 0x19f   :  { %1267 = vmatprep.mubr.bf16.mxu1 %v2801_v32 }
 0x1a6   :  { %1268 = vmatmul.mubr.bf16.gmra.mrb[160].mxu1 %v2798_v30 }
 0x1a7   :  { %1277 = vmatprep.mubr.bf16.mxu1 %v2817_v12 }
 0x1ae   :  { %1278 = vmatmul.mubr.bf16.gmra.mrb[164].mxu1 %v2814_v6 }
 0x1af   :  { %1287 = vmatprep.mubr.bf16.mxu1 %v2833_v57 }
 0x1b6   :  { %1288 = vmatmul.mubr.bf16.gmra.mrb[168].mxu1 %v2830_v55 }
 0x1b7   :  { %1297 = vmatprep.mubr.bf16.mxu1 %v2845_v41 }
 0x1b9   :  { %v1029_v54 = vpop.f32.mrb[64].mxu1 }
 0x1ba   :  { %v1030_v23 = vadd.f32 %v1029_v54, %v2921_v16  ;;  %v1031_v25 = vpop.f32.mrb[65].mxu1 }
 0x1bb   :  { %v1032_v53 = vadd.f32 %v1031_v25, %v2926_v52  ;;  %v1033_v56 = vpop.f32.mrb[66].mxu1 }
 0x1bc   :  { %v1034_v27 = vadd.f32 %v1033_v56, %v2921_v16  ;;  %v1035_v29 = vpop.f32.mrb[67].mxu1  ;;  %v1348_v11 = vmax.f32 %v1030_v23, 0.0 }
 0x1bd   :  { %v1036_v60 = vadd.f32 %v1035_v29, %v2926_v52  ;;  %v1349_v35 = vmax.f32 %v1032_v53, 0.0 }
 0x1be   :  { %v1350_v62 = vmax.f32 %v1034_v27, 0.0  ;;  %1298 = vmatmul.mubr.bf16.gmra.mrb[172].mxu1 %v2842_v39 }
 0x1bf   :  { %v1351_v10 = vmax.f32 %v1036_v60, 0.0  ;;  %1307 = vmatprep.mubr.bf16.mxu1 %v2860_v28 }
 0x1c0   :  { %v1476_v13 = vpack.c.bf16 %v1350_v62, %v1348_v11 }
 0x1c1   :  { %v1477_v37 = vpack.c.bf16 %v1351_v10, %v1349_v35  ;;  %v1039_v7 = vpop.f32.mrb[68].mxu1 }
 0x1c2   :  { %v1040_v9 = vadd.f32 %v1039_v7, %v2921_v16  ;;  %v1041_v47 = vpop.f32.mrb[69].mxu1 }
 0x1c3   :  { %v1042_v49 = vadd.f32 %v1041_v47, %v2926_v52  ;;  %v1043_v30 = vpop.f32.mrb[70].mxu1  ;;  %1707 = vmatprep.mubr.bf16.mxu0 %v1477_v37 }
 0x1c4   :  { %v1044_v32 = vadd.f32 %v1043_v30, %v2921_v16  ;;  %v1045_v6 = vpop.f32.mrb[71].mxu1  ;;  %1708 = vmatmul.mubr.bf16.vlgmr.msra.gmra.mrb[64].mxu0 %v1476_v13  ;;  %v1352_v55 = vmax.f32 %v1040_v9, 0.0 }
 0x1c5   :  { %v1046_v12 = vadd.f32 %v1045_v6, %v2926_v52  ;;  %v1353_v39 = vmax.f32 %v1042_v49, 0.0 }
 0x1c6   :  { %v1354_v57 = vmax.f32 %v1044_v32, 0.0  ;;  %1308 = vmatmul.mubr.bf16.gmra.mrb[176].mxu1 %v2857_v24 }
 0x1c7   :  { %v1355_v41 = vmax.f32 %v1046_v12, 0.0  ;;  %1317 = vmatprep.mubr.bf16.mxu1 %v2872_v18 }
 0x1c8   :  { %v1478_v28 = vpack.c.bf16 %v1354_v57, %v1352_v55 }
 0x1c9   :  { %v1479_v50 = vpack.c.bf16 %v1355_v41, %v1353_v39  ;;  %v1049_v51 = vpop.f32.mrb[72].mxu1 }
 0x1ca   :  { %v1050_v5 = vadd.f32 %v1049_v51, %v2921_v16  ;;  %v1051_v58 = vpop.f32.mrb[73].mxu1 }
 0x1cb   :  { %v1052_v59 = vadd.f32 %v1051_v58, %v2926_v52  ;;  %v1053_v61 = vpop.f32.mrb[74].mxu1  ;;  %1715 = vmatprep.mubr.bf16.mxu0 %v1479_v50 }
 0x1cc   :  { %v1054_v63 = vadd.f32 %v1053_v61, %v2921_v16  ;;  %v1055_v0 = vpop.f32.mrb[75].mxu1  ;;  %1716 = vmatmul.mubr.bf16.gmra.mrb[68].mxu0 %v1478_v28  ;;  %v1356_v2 = vmax.f32 %v1050_v5, 0.0 }
 0x1cd   :  { %v1056_v24 = vadd.f32 %v1055_v0, %v2926_v52  ;;  %v1357_v18 = vmax.f32 %v1052_v59, 0.0 }
 0x1ce   :  { %v1358_v4 = vmax.f32 %v1054_v63, 0.0  ;;  %1318 = vmatmul.mubr.bf16.gmra.mrb[180].mxu1 %v2869_v14 }
 0x1cf   :  { %v1359_v8 = vmax.f32 %v1056_v24, 0.0  ;;  %1327 = vmatprep.mubr.bf16.mxu1 %v2884_v3 }
 0x1d0   :  { %v1480_v17 = vpack.c.bf16 %v1358_v4, %v1356_v2 }
 0x1d1   :  { %v1481_v19 = vpack.c.bf16 %v1359_v8, %v1357_v18  ;;  %v1059_v20 = vpop.f32.mrb[76].mxu1 }
 0x1d2   :  { %v1060_v21 = vadd.f32 %v1059_v20, %v2921_v16  ;;  %v1061_v22 = vpop.f32.mrb[77].mxu1 }
 0x1d3   :  { %v1062_v26 = vadd.f32 %v1061_v22, %v2926_v52  ;;  %v1063_v31 = vpop.f32.mrb[78].mxu1  ;;  %1723 = vmatprep.mubr.bf16.mxu0 %v1481_v19 }
 0x1d4   :  { %v1064_v33 = vadd.f32 %v1063_v31, %v2921_v16  ;;  %v1065_v34 = vpop.f32.mrb[79].mxu1  ;;  %1724 = vmatmul.mubr.bf16.gmra.mrb[72].mxu0 %v1480_v17  ;;  %v1360_v36 = vmax.f32 %v1060_v21, 0.0 }
 0x1d5   :  { %v1066_v14 = vadd.f32 %v1065_v34, %v2926_v52  ;;  %v1361_v3 = vmax.f32 %v1062_v26, 0.0 }
 0x1d6   :  { %v1362_v38 = vmax.f32 %v1064_v33, 0.0  ;;  %1328 = vmatmul.mubr.bf16.gmra.mrb[184].mxu1 %v2881_v1 }
 0x1d7   :  { %v1363_v40 = vmax.f32 %v1066_v14, 0.0  ;;  %1337 = vmatprep.mubr.bf16.mxu1 %v2893_v48 }
 0x1d8   :  { %v1482_v42 = vpack.c.bf16 %v1362_v38, %v1360_v36 }
 0x1d9   :  { %v1483_v43 = vpack.c.bf16 %v1363_v40, %v1361_v3  ;;  %v1069_v44 = vpop.f32.mrb[80].mxu1 }
 0x1da   :  { %v1070_v45 = vadd.f32 %v1069_v44, %v2921_v16  ;;  %v1071_v15 = vpop.f32.mrb[81].mxu1 }
 0x1db   :  { %v1072_v54 = vadd.f32 %v1071_v15, %v2926_v52  ;;  %v1073_v23 = vpop.f32.mrb[82].mxu1  ;;  %1731 = vmatprep.mubr.bf16.mxu0 %v1483_v43 }
 0x1dc   :  { %v1074_v25 = vadd.f32 %v1073_v23, %v2921_v16  ;;  %v1075_v53 = vpop.f32.mrb[83].mxu1  ;;  %1732 = vmatmul.mubr.bf16.gmra.mrb[76].mxu0 %v1482_v42  ;;  %v1364_v56 = vmax.f32 %v1070_v45, 0.0 }
 0x1dd   :  { %v1076_v1 = vadd.f32 %v1075_v53, %v2926_v52  ;;  %v1365_v48 = vmax.f32 %v1072_v54, 0.0 }
 0x1de   :  { %v1366_v27 = vmax.f32 %v1074_v25, 0.0  ;;  %1338 = vmatmul.mubr.bf16.gmra.mrb[188].mxu1 %v2890_v46 }
 0x1df   :  { %v1367_v29 = vmax.f32 %v1076_v1, 0.0 }
 0x1e0   :  { %v1484_v60 = vpack.c.bf16 %v1366_v27, %v1364_v56 }
 0x1e1   :  { %v1485_v11 = vpack.c.bf16 %v1367_v29, %v1365_v48  ;;  %v1079_v62 = vpop.f32.mrb[84].mxu1 }
 0x1e2   :  { %v1080_v35 = vadd.f32 %v1079_v62, %v2921_v16  ;;  %v1081_v10 = vpop.f32.mrb[85].mxu1 }
 0x1e3   :  { %v1082_v13 = vadd.f32 %v1081_v10, %v2926_v52  ;;  %v1083_v37 = vpop.f32.mrb[86].mxu1  ;;  %1739 = vmatprep.mubr.bf16.mxu0 %v1485_v11 }
 0x1e4   :  { %v1084_v7 = vadd.f32 %v1083_v37, %v2921_v16  ;;  %v1085_v9 = vpop.f32.mrb[87].mxu1  ;;  %1740 = vmatmul.mubr.bf16.gmra.mrb[80].mxu0 %v1484_v60  ;;  %v1368_v49 = vmax.f32 %v1080_v35, 0.0 }
 0x1e5   :  { %v1086_v47 = vadd.f32 %v1085_v9, %v2926_v52  ;;  %v1369_v30 = vmax.f32 %v1082_v13, 0.0 }
 0x1e6   :  { %v1370_v46 = vmax.f32 %v1084_v7, 0.0 }
 0x1e7   :  { %v1371_v32 = vmax.f32 %v1086_v47, 0.0 }
 0x1e8   :  { %v1486_v6 = vpack.c.bf16 %v1370_v46, %v1368_v49 }
 0x1e9   :  { %v1487_v12 = vpack.c.bf16 %v1371_v32, %v1369_v30  ;;  %v1089_v55 = vpop.f32.mrb[88].mxu1 }
 0x1ea   :  { %v1090_v57 = vadd.f32 %v1089_v55, %v2921_v16  ;;  %v1091_v39 = vpop.f32.mrb[89].mxu1 }
 0x1eb   :  { %v1092_v41 = vadd.f32 %v1091_v39, %v2926_v52  ;;  %v1093_v28 = vpop.f32.mrb[90].mxu1  ;;  %1747 = vmatprep.mubr.bf16.mxu0 %v1487_v12 }
 0x1ec   :  { %v1094_v50 = vadd.f32 %v1093_v28, %v2921_v16  ;;  %v1095_v51 = vpop.f32.mrb[91].mxu1  ;;  %1748 = vmatmul.mubr.bf16.gmra.mrb[84].mxu0 %v1486_v6  ;;  %v1372_v58 = vmax.f32 %v1090_v57, 0.0 }
 0x1ed   :  { %v1096_v5 = vadd.f32 %v1095_v51, %v2926_v52  ;;  %v1373_v61 = vmax.f32 %v1092_v41, 0.0 }
 0x1ee   :  { %v1374_v59 = vmax.f32 %v1094_v50, 0.0 }
 0x1ef   :  { %v1375_v63 = vmax.f32 %v1096_v5, 0.0 }
 0x1f0   :  { %v1488_v0 = vpack.c.bf16 %v1374_v59, %v1372_v58 }
 0x1f1   :  { %v1489_v24 = vpack.c.bf16 %v1375_v63, %v1373_v61  ;;  %v1099_v2 = vpop.f32.mrb[92].mxu1 }
 0x1f2   :  { %v1100_v4 = vadd.f32 %v1099_v2, %v2921_v16  ;;  %v1101_v18 = vpop.f32.mrb[93].mxu1 }
 0x1f3   :  { %v1102_v8 = vadd.f32 %v1101_v18, %v2926_v52  ;;  %v1103_v17 = vpop.f32.mrb[94].mxu1  ;;  %1755 = vmatprep.mubr.bf16.mxu0 %v1489_v24 }
 0x1f4   :  { %v1104_v19 = vadd.f32 %v1103_v17, %v2921_v16  ;;  %v1105_v20 = vpop.f32.mrb[95].mxu1  ;;  %1756 = vmatmul.mubr.bf16.gmra.mrb[88].mxu0 %v1488_v0  ;;  %v1376_v22 = vmax.f32 %v1100_v4, 0.0 }
 0x1f5   :  { %v1106_v21 = vadd.f32 %v1105_v20, %v2926_v52  ;;  %v1377_v31 = vmax.f32 %v1102_v8, 0.0 }
 0x1f6   :  { %v1378_v26 = vmax.f32 %v1104_v19, 0.0 }
 0x1f7   :  { %v1379_v33 = vmax.f32 %v1106_v21, 0.0 }
 0x1f8   :  { %v1490_v34 = vpack.c.bf16 %v1378_v26, %v1376_v22 }
 0x1f9   :  { %v1491_v14 = vpack.c.bf16 %v1379_v33, %v1377_v31  ;;  %v1109_v36 = vpop.f32.mrb[96].mxu1 }
 0x1fa   :  { %v1110_v38 = vadd.f32 %v1109_v36, %v2921_v16  ;;  %v1111_v3 = vpop.f32.mrb[97].mxu1 }
 0x1fb   :  { %v1112_v40 = vadd.f32 %v1111_v3, %v2926_v52  ;;  %v1113_v42 = vpop.f32.mrb[98].mxu1  ;;  %1763 = vmatprep.mubr.bf16.mxu0 %v1491_v14 }
 0x1fc   :  { %v1114_v43 = vadd.f32 %v1113_v42, %v2921_v16  ;;  %v1115_v44 = vpop.f32.mrb[99].mxu1  ;;  %1764 = vmatmul.mubr.bf16.gmra.mrb[92].mxu0 %v1490_v34  ;;  %v1380_v15 = vmax.f32 %v1110_v38, 0.0 }
 0x1fd   :  { %v1116_v45 = vadd.f32 %v1115_v44, %v2926_v52  ;;  %v1381_v23 = vmax.f32 %v1112_v40, 0.0 }
 0x1fe   :  { %v1382_v54 = vmax.f32 %v1114_v43, 0.0 }
 0x1ff   :  { %v1383_v25 = vmax.f32 %v1116_v45, 0.0 }
 0x200   :  { %v1492_v53 = vpack.c.bf16 %v1382_v54, %v1380_v15 }
 0x201   :  { %v1493_v1 = vpack.c.bf16 %v1383_v25, %v1381_v23  ;;  %v1119_v56 = vpop.f32.mrb[100].mxu1 }
 0x202   :  { %v1120_v27 = vadd.f32 %v1119_v56, %v2921_v16  ;;  %v1121_v48 = vpop.f32.mrb[101].mxu1 }
 0x203   :  { %v1122_v29 = vadd.f32 %v1121_v48, %v2926_v52  ;;  %v1123_v60 = vpop.f32.mrb[102].mxu1  ;;  %1771 = vmatprep.mubr.bf16.mxu0 %v1493_v1 }
 0x204   :  { %v1124_v11 = vadd.f32 %v1123_v60, %v2921_v16  ;;  %v1125_v62 = vpop.f32.mrb[103].mxu1  ;;  %1772 = vmatmul.mubr.bf16.gmra.mrb[96].mxu0 %v1492_v53  ;;  %v1384_v10 = vmax.f32 %v1120_v27, 0.0 }
 0x205   :  { %v1126_v35 = vadd.f32 %v1125_v62, %v2926_v52  ;;  %v1385_v37 = vmax.f32 %v1122_v29, 0.0 }
 0x206   :  { %v1386_v13 = vmax.f32 %v1124_v11, 0.0 }
 0x207   :  { %v1387_v7 = vmax.f32 %v1126_v35, 0.0 }
 0x208   :  { %v1494_v9 = vpack.c.bf16 %v1386_v13, %v1384_v10 }
 0x209   :  { %v1495_v47 = vpack.c.bf16 %v1387_v7, %v1385_v37  ;;  %v1129_v49 = vpop.f32.mrb[104].mxu1 }
 0x20a   :  { %v1130_v46 = vadd.f32 %v1129_v49, %v2921_v16  ;;  %v1131_v30 = vpop.f32.mrb[105].mxu1 }
 0x20b   :  { %v1132_v32 = vadd.f32 %v1131_v30, %v2926_v52  ;;  %v1133_v6 = vpop.f32.mrb[106].mxu1  ;;  %1779 = vmatprep.mubr.bf16.mxu0 %v1495_v47 }
 0x20c   :  { %v1134_v12 = vadd.f32 %v1133_v6, %v2921_v16  ;;  %v1135_v55 = vpop.f32.mrb[107].mxu1  ;;  %1780 = vmatmul.mubr.bf16.gmra.mrb[100].mxu0 %v1494_v9  ;;  %v1388_v39 = vmax.f32 %v1130_v46, 0.0 }
 0x20d   :  { %v1136_v57 = vadd.f32 %v1135_v55, %v2926_v52  ;;  %v1389_v28 = vmax.f32 %v1132_v32, 0.0 }
 0x20e   :  { %v1390_v41 = vmax.f32 %v1134_v12, 0.0 }
 0x20f   :  { %v1391_v50 = vmax.f32 %v1136_v57, 0.0 }
 0x210   :  { %v1496_v51 = vpack.c.bf16 %v1390_v41, %v1388_v39 }
 0x211   :  { %v1497_v5 = vpack.c.bf16 %v1391_v50, %v1389_v28  ;;  %v1139_v58 = vpop.f32.mrb[108].mxu1 }
 0x212   :  { %v1140_v59 = vadd.f32 %v1139_v58, %v2921_v16  ;;  %v1141_v61 = vpop.f32.mrb[109].mxu1 }
 0x213   :  { %v1142_v63 = vadd.f32 %v1141_v61, %v2926_v52  ;;  %v1143_v0 = vpop.f32.mrb[110].mxu1  ;;  %1787 = vmatprep.mubr.bf16.mxu0 %v1497_v5 }
 0x214   :  { %v1144_v24 = vadd.f32 %v1143_v0, %v2921_v16  ;;  %v1145_v2 = vpop.f32.mrb[111].mxu1  ;;  %1788 = vmatmul.mubr.bf16.gmra.mrb[104].mxu0 %v1496_v51  ;;  %v1392_v18 = vmax.f32 %v1140_v59, 0.0 }
 0x215   :  { %v1146_v4 = vadd.f32 %v1145_v2, %v2926_v52  ;;  %v1393_v17 = vmax.f32 %v1142_v63, 0.0 }
 0x216   :  { %v1394_v8 = vmax.f32 %v1144_v24, 0.0 }
 0x217   :  { %v1395_v19 = vmax.f32 %v1146_v4, 0.0 }
 0x218   :  { %v1498_v20 = vpack.c.bf16 %v1394_v8, %v1392_v18 }
 0x219   :  { %v1499_v21 = vpack.c.bf16 %v1395_v19, %v1393_v17  ;;  %v1149_v22 = vpop.f32.mrb[112].mxu1 }
 0x21a   :  { %v1150_v26 = vadd.f32 %v1149_v22, %v2921_v16  ;;  %v1151_v31 = vpop.f32.mrb[113].mxu1 }
 0x21b   :  { %v1152_v33 = vadd.f32 %v1151_v31, %v2926_v52  ;;  %v1153_v34 = vpop.f32.mrb[114].mxu1  ;;  %1795 = vmatprep.mubr.bf16.mxu0 %v1499_v21 }
 0x21c   :  { %v1154_v14 = vadd.f32 %v1153_v34, %v2921_v16  ;;  %v1155_v36 = vpop.f32.mrb[115].mxu1  ;;  %1796 = vmatmul.mubr.bf16.gmra.mrb[108].mxu0 %v1498_v20  ;;  %v1396_v3 = vmax.f32 %v1150_v26, 0.0 }
 0x21d   :  { %v1156_v38 = vadd.f32 %v1155_v36, %v2926_v52  ;;  %v1397_v42 = vmax.f32 %v1152_v33, 0.0 }
 0x21e   :  { %v1398_v40 = vmax.f32 %v1154_v14, 0.0 }
 0x21f   :  { %v1399_v43 = vmax.f32 %v1156_v38, 0.0 }
 0x220   :  { %v1500_v44 = vpack.c.bf16 %v1398_v40, %v1396_v3 }
 0x221   :  { %v1501_v45 = vpack.c.bf16 %v1399_v43, %v1397_v42  ;;  %v1159_v15 = vpop.f32.mrb[116].mxu1 }
 0x222   :  { %v1160_v54 = vadd.f32 %v1159_v15, %v2921_v16  ;;  %v1161_v23 = vpop.f32.mrb[117].mxu1 }
 0x223   :  { %v1162_v25 = vadd.f32 %v1161_v23, %v2926_v52  ;;  %v1163_v53 = vpop.f32.mrb[118].mxu1  ;;  %1803 = vmatprep.mubr.bf16.mxu0 %v1501_v45 }
 0x224   :  { %v1164_v1 = vadd.f32 %v1163_v53, %v2921_v16  ;;  %v1165_v56 = vpop.f32.mrb[119].mxu1  ;;  %1804 = vmatmul.mubr.bf16.gmra.mrb[112].mxu0 %v1500_v44  ;;  %v1400_v48 = vmax.f32 %v1160_v54, 0.0 }
 0x225   :  { %v1166_v27 = vadd.f32 %v1165_v56, %v2926_v52  ;;  %v1401_v60 = vmax.f32 %v1162_v25, 0.0 }
 0x226   :  { %v1402_v29 = vmax.f32 %v1164_v1, 0.0 }
 0x227   :  { %v1403_v11 = vmax.f32 %v1166_v27, 0.0 }
 0x228   :  { %v1502_v62 = vpack.c.bf16 %v1402_v29, %v1400_v48 }
 0x229   :  { %v1503_v35 = vpack.c.bf16 %v1403_v11, %v1401_v60  ;;  %v1169_v10 = vpop.f32.mrb[120].mxu1 }
 0x22a   :  { %v1170_v13 = vadd.f32 %v1169_v10, %v2921_v16  ;;  %v1171_v37 = vpop.f32.mrb[121].mxu1 }
 0x22b   :  { %v1172_v7 = vadd.f32 %v1171_v37, %v2926_v52  ;;  %v1173_v9 = vpop.f32.mrb[122].mxu1  ;;  %1811 = vmatprep.mubr.bf16.mxu0 %v1503_v35 }
 0x22c   :  { %v1174_v47 = vadd.f32 %v1173_v9, %v2921_v16  ;;  %v1175_v49 = vpop.f32.mrb[123].mxu1  ;;  %1812 = vmatmul.mubr.bf16.gmra.mrb[116].mxu0 %v1502_v62  ;;  %v1404_v30 = vmax.f32 %v1170_v13, 0.0 }
 0x22d   :  { %v1176_v46 = vadd.f32 %v1175_v49, %v2926_v52  ;;  %v1405_v6 = vmax.f32 %v1172_v7, 0.0 }
 0x22e   :  { %v1406_v32 = vmax.f32 %v1174_v47, 0.0 }
 0x22f   :  { %v1407_v12 = vmax.f32 %v1176_v46, 0.0 }
 0x230   :  { %v1504_v55 = vpack.c.bf16 %v1406_v32, %v1404_v30 }
 0x231   :  { %v1505_v57 = vpack.c.bf16 %v1407_v12, %v1405_v6  ;;  %v1179_v39 = vpop.f32.mrb[124].mxu1 }
 0x232   :  { %v1180_v41 = vadd.f32 %v1179_v39, %v2921_v16  ;;  %v1181_v28 = vpop.f32.mrb[125].mxu1 }
 0x233   :  { %v1182_v50 = vadd.f32 %v1181_v28, %v2926_v52  ;;  %v1183_v51 = vpop.f32.mrb[126].mxu1  ;;  %1819 = vmatprep.mubr.bf16.mxu0 %v1505_v57 }
 0x234   :  { %v1184_v5 = vadd.f32 %v1183_v51, %v2921_v16  ;;  %v1185_v58 = vpop.f32.mrb[127].mxu1  ;;  %1820 = vmatmul.mubr.bf16.gmra.mrb[120].mxu0 %v1504_v55  ;;  %v1408_v61 = vmax.f32 %v1180_v41, 0.0 }
 0x235   :  { %v1186_v59 = vadd.f32 %v1185_v58, %v2926_v52  ;;  %v1409_v0 = vmax.f32 %v1182_v50, 0.0 }
 0x236   :  { %v1410_v63 = vmax.f32 %v1184_v5, 0.0 }
 0x237   :  { %v1411_v24 = vmax.f32 %v1186_v59, 0.0 }
 0x238   :  { %v1506_v2 = vpack.c.bf16 %v1410_v63, %v1408_v61 }
 0x239   :  { %v1507_v4 = vpack.c.bf16 %v1411_v24, %v1409_v0  ;;  %v1189_v18 = vpop.f32.mrb[128].mxu1 }
 0x23a   :  { %v1190_v8 = vadd.f32 %v1189_v18, %v2921_v16  ;;  %v1191_v17 = vpop.f32.mrb[129].mxu1 }
 0x23b   :  { %v1192_v19 = vadd.f32 %v1191_v17, %v2926_v52  ;;  %v1193_v20 = vpop.f32.mrb[130].mxu1  ;;  %1827 = vmatprep.mubr.bf16.mxu0 %v1507_v4 }
 0x23c   :  { %v1194_v21 = vadd.f32 %v1193_v20, %v2921_v16  ;;  %v1195_v22 = vpop.f32.mrb[131].mxu1  ;;  %1828 = vmatmul.mubr.bf16.gmra.mrb[124].mxu0 %v1506_v2  ;;  %v1412_v31 = vmax.f32 %v1190_v8, 0.0 }
 0x23d   :  { %v1196_v26 = vadd.f32 %v1195_v22, %v2926_v52  ;;  %v1413_v34 = vmax.f32 %v1192_v19, 0.0 }
 0x23e   :  { %v1414_v33 = vmax.f32 %v1194_v21, 0.0 }
 0x23f   :  { %v1415_v14 = vmax.f32 %v1196_v26, 0.0 }
 0x240   :  { %v1508_v36 = vpack.c.bf16 %v1414_v33, %v1412_v31 }
 0x241   :  { %v1509_v38 = vpack.c.bf16 %v1415_v14, %v1413_v34  ;;  %v1199_v3 = vpop.f32.mrb[132].mxu1 }
 0x242   :  { %v1200_v40 = vadd.f32 %v1199_v3, %v2921_v16  ;;  %v1201_v42 = vpop.f32.mrb[133].mxu1 }
 0x243   :  { %v1202_v43 = vadd.f32 %v1201_v42, %v2926_v52  ;;  %v1203_v44 = vpop.f32.mrb[134].mxu1  ;;  %1835 = vmatprep.mubr.bf16.mxu0 %v1509_v38 }
 0x244   :  { %v1204_v45 = vadd.f32 %v1203_v44, %v2921_v16  ;;  %v1205_v15 = vpop.f32.mrb[135].mxu1  ;;  %1836 = vmatmul.mubr.bf16.gmra.mrb[128].mxu0 %v1508_v36  ;;  %v1416_v23 = vmax.f32 %v1200_v40, 0.0 }
 0x245   :  { %v1206_v54 = vadd.f32 %v1205_v15, %v2926_v52  ;;  %v1417_v53 = vmax.f32 %v1202_v43, 0.0 }
 0x246   :  { %v1418_v25 = vmax.f32 %v1204_v45, 0.0 }
 0x247   :  { %v1419_v1 = vmax.f32 %v1206_v54, 0.0 }
 0x248   :  { %v1510_v56 = vpack.c.bf16 %v1418_v25, %v1416_v23 }
 0x249   :  { %v1511_v27 = vpack.c.bf16 %v1419_v1, %v1417_v53  ;;  %v1209_v48 = vpop.f32.mrb[136].mxu1 }
 0x24a   :  { %v1210_v29 = vadd.f32 %v1209_v48, %v2921_v16  ;;  %v1211_v60 = vpop.f32.mrb[137].mxu1 }
 0x24b   :  { %v1212_v11 = vadd.f32 %v1211_v60, %v2926_v52  ;;  %v1213_v62 = vpop.f32.mrb[138].mxu1  ;;  %1843 = vmatprep.mubr.bf16.mxu0 %v1511_v27 }
 0x24c   :  { %v1214_v35 = vadd.f32 %v1213_v62, %v2921_v16  ;;  %v1215_v10 = vpop.f32.mrb[139].mxu1  ;;  %1844 = vmatmul.mubr.bf16.gmra.mrb[132].mxu0 %v1510_v56  ;;  %v1420_v37 = vmax.f32 %v1210_v29, 0.0 }
 0x24d   :  { %v1216_v13 = vadd.f32 %v1215_v10, %v2926_v52  ;;  %v1421_v9 = vmax.f32 %v1212_v11, 0.0 }
 0x24e   :  { %v1422_v7 = vmax.f32 %v1214_v35, 0.0 }
 0x24f   :  { %v1423_v47 = vmax.f32 %v1216_v13, 0.0 }
 0x250   :  { %v1512_v49 = vpack.c.bf16 %v1422_v7, %v1420_v37 }
 0x251   :  { %v1513_v46 = vpack.c.bf16 %v1423_v47, %v1421_v9  ;;  %v1219_v30 = vpop.f32.mrb[140].mxu1 }
 0x252   :  { %v1220_v32 = vadd.f32 %v1219_v30, %v2921_v16  ;;  %v1221_v6 = vpop.f32.mrb[141].mxu1 }
 0x253   :  { %v1222_v12 = vadd.f32 %v1221_v6, %v2926_v52  ;;  %v1223_v55 = vpop.f32.mrb[142].mxu1  ;;  %1851 = vmatprep.mubr.bf16.mxu0 %v1513_v46 }
 0x254   :  { %v1224_v57 = vadd.f32 %v1223_v55, %v2921_v16  ;;  %v1225_v39 = vpop.f32.mrb[143].mxu1  ;;  %1852 = vmatmul.mubr.bf16.gmra.mrb[136].mxu0 %v1512_v49  ;;  %v1424_v28 = vmax.f32 %v1220_v32, 0.0 }
 0x255   :  { %v1226_v41 = vadd.f32 %v1225_v39, %v2926_v52  ;;  %v1425_v51 = vmax.f32 %v1222_v12, 0.0 }
 0x256   :  { %v1426_v50 = vmax.f32 %v1224_v57, 0.0 }
 0x257   :  { %v1427_v5 = vmax.f32 %v1226_v41, 0.0 }
 0x258   :  { %v1514_v58 = vpack.c.bf16 %v1426_v50, %v1424_v28 }
 0x259   :  { %v1515_v59 = vpack.c.bf16 %v1427_v5, %v1425_v51  ;;  %v1229_v61 = vpop.f32.mrb[144].mxu1 }
 0x25a   :  { %v1230_v63 = vadd.f32 %v1229_v61, %v2921_v16  ;;  %v1231_v0 = vpop.f32.mrb[145].mxu1 }
 0x25b   :  { %v1232_v24 = vadd.f32 %v1231_v0, %v2926_v52  ;;  %v1233_v2 = vpop.f32.mrb[146].mxu1  ;;  %1859 = vmatprep.mubr.bf16.mxu0 %v1515_v59 }
 0x25c   :  { %v1234_v4 = vadd.f32 %v1233_v2, %v2921_v16  ;;  %v1235_v18 = vpop.f32.mrb[147].mxu1  ;;  %1860 = vmatmul.mubr.bf16.gmra.mrb[140].mxu0 %v1514_v58  ;;  %v1428_v17 = vmax.f32 %v1230_v63, 0.0 }
 0x25d   :  { %v1236_v8 = vadd.f32 %v1235_v18, %v2926_v52  ;;  %v1429_v20 = vmax.f32 %v1232_v24, 0.0 }
 0x25e   :  { %v1430_v19 = vmax.f32 %v1234_v4, 0.0 }
 0x25f   :  { %v1431_v21 = vmax.f32 %v1236_v8, 0.0 }
 0x260   :  { %v1516_v22 = vpack.c.bf16 %v1430_v19, %v1428_v17 }
 0x261   :  { %v1517_v26 = vpack.c.bf16 %v1431_v21, %v1429_v20  ;;  %v1239_v31 = vpop.f32.mrb[148].mxu1 }
 0x262   :  { %v1240_v33 = vadd.f32 %v1239_v31, %v2921_v16  ;;  %v1241_v34 = vpop.f32.mrb[149].mxu1 }
 0x263   :  { %v1242_v14 = vadd.f32 %v1241_v34, %v2926_v52  ;;  %v1243_v36 = vpop.f32.mrb[150].mxu1  ;;  %1867 = vmatprep.mubr.bf16.mxu0 %v1517_v26 }
 0x264   :  { %v1244_v38 = vadd.f32 %v1243_v36, %v2921_v16  ;;  %v1245_v3 = vpop.f32.mrb[151].mxu1  ;;  %1868 = vmatmul.mubr.bf16.gmra.mrb[144].mxu0 %v1516_v22  ;;  %v1432_v42 = vmax.f32 %v1240_v33, 0.0 }
 0x265   :  { %v1246_v40 = vadd.f32 %v1245_v3, %v2926_v52  ;;  %v1433_v44 = vmax.f32 %v1242_v14, 0.0 }
 0x266   :  { %v1434_v43 = vmax.f32 %v1244_v38, 0.0 }
 0x267   :  { %v1435_v45 = vmax.f32 %v1246_v40, 0.0 }
 0x268   :  { %v1518_v15 = vpack.c.bf16 %v1434_v43, %v1432_v42 }
 0x269   :  { %v1519_v54 = vpack.c.bf16 %v1435_v45, %v1433_v44  ;;  %v1249_v23 = vpop.f32.mrb[152].mxu1 }
 0x26a   :  { %v1250_v25 = vadd.f32 %v1249_v23, %v2921_v16  ;;  %v1251_v53 = vpop.f32.mrb[153].mxu1 }
 0x26b   :  { %v1252_v1 = vadd.f32 %v1251_v53, %v2926_v52  ;;  %v1253_v56 = vpop.f32.mrb[154].mxu1  ;;  %1875 = vmatprep.mubr.bf16.mxu0 %v1519_v54 }
 0x26c   :  { %v1254_v27 = vadd.f32 %v1253_v56, %v2921_v16  ;;  %v1255_v48 = vpop.f32.mrb[155].mxu1  ;;  %1876 = vmatmul.mubr.bf16.gmra.mrb[148].mxu0 %v1518_v15  ;;  %v1436_v60 = vmax.f32 %v1250_v25, 0.0 }
 0x26d   :  { %v1256_v29 = vadd.f32 %v1255_v48, %v2926_v52  ;;  %v1437_v62 = vmax.f32 %v1252_v1, 0.0 }
 0x26e   :  { %v1438_v11 = vmax.f32 %v1254_v27, 0.0 }
 0x26f   :  { %v1439_v35 = vmax.f32 %v1256_v29, 0.0 }
 0x270   :  { %v1520_v10 = vpack.c.bf16 %v1438_v11, %v1436_v60 }
 0x271   :  { %v1521_v13 = vpack.c.bf16 %v1439_v35, %v1437_v62  ;;  %v1259_v37 = vpop.f32.mrb[156].mxu1 }
 0x272   :  { %v1260_v7 = vadd.f32 %v1259_v37, %v2921_v16  ;;  %v1261_v9 = vpop.f32.mrb[157].mxu1 }
 0x273   :  { %v1262_v47 = vadd.f32 %v1261_v9, %v2926_v52  ;;  %v1263_v49 = vpop.f32.mrb[158].mxu1  ;;  %1883 = vmatprep.mubr.bf16.mxu0 %v1521_v13  ;;  %v3052_v9 = vld [vmem:[%s3152_s6] ss:$0 sm:$0xff]  ;;  %s2225_s6 = smov [#allocation2]  }
 0x274   :  { %v1264_v46 = vadd.f32 %v1263_v49, %v2921_v16  ;;  %v1265_v30 = vpop.f32.mrb[159].mxu1  ;;  %1884 = vmatmul.mubr.bf16.gmra.mrb[152].mxu0 %v1520_v10  ;;  %v1440_v6 = vmax.f32 %v1260_v7, 0.0  ;;  %s2033_s2 = sshll.u32 %s2225_s6, 4  ;;  %s2034_s2 = int_to_ptr.vmem [resolvable:$true] %s2033_s2 }
 0x275   :  { %v1266_v32 = vadd.f32 %v1265_v30, %v2926_v52  ;;  %v1441_v55 = vmax.f32 %v1262_v47, 0.0  ;;  %s2200_s8 = scalar_lea.vmem %s2034_s2, 8192  ;;  %p2205_p1 = scmp.lt.s32.totalorder %s2034_s2, %s2034_s2 }
 0x276   :  { %v1442_v12 = vmax.f32 %v1264_v46, 0.0  ;;  %p2201_p0 = scmp.ne.s32.totalorder %s2034_s2, %s2200_s8  ;;  %p2206_p2 = scmp.lt.s32.totalorder %s2200_s8, %s2200_s8 }
 0x277   :  { %v1443_v57 = vmax.f32 %v1266_v32, 0.0 }
 0x278   :  { %v1522_v39 = vpack.c.bf16 %v1442_v12, %v1440_v6  ;;  %p2207_p3 = por %p2206_p2, %p2205_p1 }
 0x279   :  { %v1523_v41 = vpack.c.bf16 %v1443_v57, %v1441_v55  ;;  %v1269_v28 = vpop.f32.mrb[160].mxu1 }
 0x27a   :  { %v1270_v50 = vadd.f32 %v1269_v28, %v2921_v16  ;;  %v1271_v51 = vpop.f32.mrb[161].mxu1  ;;  %p2208_p4 = pnand %p2207_p3, %p2201_p0 }
 0x27b   :  { %v1272_v5 = vadd.f32 %v1271_v51, %v2926_v52  ;;  %v1273_v58 = vpop.f32.mrb[162].mxu1  ;;  %1891 = vmatprep.mubr.bf16.mxu0 %v1523_v41 }
 0x27c   :  { %v1274_v59 = vadd.f32 %v1273_v58, %v2921_v16  ;;  %v1275_v61 = vpop.f32.mrb[163].mxu1  ;;  %1892 = vmatmul.mubr.bf16.gmra.mrb[156].mxu0 %v1522_v39  ;;  %v1444_v0 = vmax.f32 %v1270_v50, 0.0 }
 0x27d   :  { %v1276_v63 = vadd.f32 %v1275_v61, %v2926_v52  ;;  %v1445_v2 = vmax.f32 %v1272_v5, 0.0 }
 0x27e   :  { %v1446_v24 = vmax.f32 %v1274_v59, 0.0 }
 0x27f   :  { %v1447_v4 = vmax.f32 %v1276_v63, 0.0 }
 0x280   :  { %v1524_v18 = vpack.c.bf16 %v1446_v24, %v1444_v0 }
 0x281   :  { %v1525_v8 = vpack.c.bf16 %v1447_v4, %v1445_v2  ;;  %v1279_v17 = vpop.f32.mrb[164].mxu1 }
 0x282   :  { %v1280_v19 = vadd.f32 %v1279_v17, %v2921_v16  ;;  %v1281_v20 = vpop.f32.mrb[165].mxu1 }
 0x283   :  { %v1282_v21 = vadd.f32 %v1281_v20, %v2926_v52  ;;  %v1283_v22 = vpop.f32.mrb[166].mxu1  ;;  %1899 = vmatprep.mubr.bf16.mxu0 %v1525_v8 }
 0x284   :  { %v1284_v26 = vadd.f32 %v1283_v22, %v2921_v16  ;;  %v1285_v31 = vpop.f32.mrb[167].mxu1  ;;  %1900 = vmatmul.mubr.bf16.gmra.mrb[160].mxu0 %v1524_v18  ;;  %v1448_v34 = vmax.f32 %v1280_v19, 0.0 }
 0x285   :  { %v1286_v33 = vadd.f32 %v1285_v31, %v2926_v52  ;;  %v1449_v36 = vmax.f32 %v1282_v21, 0.0 }
 0x286   :  { %v1450_v14 = vmax.f32 %v1284_v26, 0.0 }
 0x287   :  { %v1451_v38 = vmax.f32 %v1286_v33, 0.0 }
 0x288   :  { %v1526_v3 = vpack.c.bf16 %v1450_v14, %v1448_v34 }
 0x289   :  { %v1527_v40 = vpack.c.bf16 %v1451_v38, %v1449_v36  ;;  %v1289_v42 = vpop.f32.mrb[168].mxu1 }
 0x28a   :  { %v1290_v43 = vadd.f32 %v1289_v42, %v2921_v16  ;;  %v1291_v44 = vpop.f32.mrb[169].mxu1 }
 0x28b   :  { %v1292_v45 = vadd.f32 %v1291_v44, %v2926_v52  ;;  %v1293_v15 = vpop.f32.mrb[170].mxu1  ;;  %1907 = vmatprep.mubr.bf16.mxu0 %v1527_v40 }
 0x28c   :  { %v1294_v54 = vadd.f32 %v1293_v15, %v2921_v16  ;;  %v1295_v23 = vpop.f32.mrb[171].mxu1  ;;  %1908 = vmatmul.mubr.bf16.gmra.mrb[164].mxu0 %v1526_v3  ;;  %v1452_v53 = vmax.f32 %v1290_v43, 0.0 }
 0x28d   :  { %v1296_v25 = vadd.f32 %v1295_v23, %v2926_v52  ;;  %v1453_v56 = vmax.f32 %v1292_v45, 0.0 }
 0x28e   :  { %v1454_v1 = vmax.f32 %v1294_v54, 0.0 }
 0x28f   :  { %v1455_v27 = vmax.f32 %v1296_v25, 0.0 }
 0x290   :  { %v1528_v48 = vpack.c.bf16 %v1454_v1, %v1452_v53 }
 0x291   :  { %v1529_v29 = vpack.c.bf16 %v1455_v27, %v1453_v56  ;;  %v1299_v60 = vpop.f32.mrb[172].mxu1 }
 0x292   :  { %v1300_v11 = vadd.f32 %v1299_v60, %v2921_v16  ;;  %v1301_v62 = vpop.f32.mrb[173].mxu1 }
 0x293   :  { %v1302_v35 = vadd.f32 %v1301_v62, %v2926_v52  ;;  %v1303_v10 = vpop.f32.mrb[174].mxu1  ;;  %1915 = vmatprep.mubr.bf16.mxu0 %v1529_v29 }
 0x294   :  { %v1304_v13 = vadd.f32 %v1303_v10, %v2921_v16  ;;  %v1305_v37 = vpop.f32.mrb[175].mxu1  ;;  %1916 = vmatmul.mubr.bf16.gmra.mrb[168].mxu0 %v1528_v48  ;;  %v1456_v47 = vmax.f32 %v1300_v11, 0.0 }
 0x295   :  { %v1306_v7 = vadd.f32 %v1305_v37, %v2926_v52  ;;  %v1457_v46 = vmax.f32 %v1302_v35, 0.0 }
 0x296   :  { %v1458_v49 = vmax.f32 %v1304_v13, 0.0 }
 0x297   :  { %v1459_v30 = vmax.f32 %v1306_v7, 0.0  ;;  %v1709_v32 = vpop.f32.mrb[64].mxu0 }
 0x298   :  { %v1530_v6 = vpack.c.bf16 %v1458_v49, %v1456_v47  ;;  %v1710_v12 = vadd.f32 %v3052_v9, %v1709_v32  ;;  %v1711_v55 = vpop.f32.mrb[65].mxu0 }
 0x299   :  { %v1531_v57 = vpack.c.bf16 %v1459_v30, %v1457_v46  ;;  %v1309_v39 = vpop.f32.mrb[176].mxu1  ;;  %v1712_v41 = vpop.f32.mrb[66].mxu0 }
 0x29a   :  { %1964 = vst [vmem:[#allocation2] sm:$0xff] %v1710_v12  ;;  %v1310_v28 = vadd.f32 %v1309_v39, %v2921_v16  ;;  %v1713_v50 = vadd.f32 %v3052_v9, %v1712_v41  ;;  %v1311_v51 = vpop.f32.mrb[177].mxu1  ;;  %v1714_v5 = vpop.f32.mrb[67].mxu0 }
 0x29b   :  { %v1312_v58 = vadd.f32 %v1311_v51, %v2926_v52  ;;  %v1313_v59 = vpop.f32.mrb[178].mxu1  ;;  %1923 = vmatprep.mubr.bf16.mxu0 %v1531_v57 }
 0x29c   :  { %1965 = vst [vmem:[#allocation2 + $0x8] sm:$0xff] %v1713_v50  ;;  %v1314_v61 = vadd.f32 %v1313_v59, %v2921_v16  ;;  %v1315_v63 = vpop.f32.mrb[179].mxu1  ;;  %1924 = vmatmul.mubr.bf16.gmra.mrb[172].mxu0 %v1530_v6  ;;  %v1460_v24 = vmax.f32 %v1310_v28, 0.0 }
 0x29d   :  { %v1316_v0 = vadd.f32 %v1315_v63, %v2926_v52  ;;  %v1461_v4 = vmax.f32 %v1312_v58, 0.0 }
 0x29e   :  { %v1462_v2 = vmax.f32 %v1314_v61, 0.0 }
 0x29f   :  { %v1463_v18 = vmax.f32 %v1316_v0, 0.0  ;;  %v1717_v8 = vpop.f32.mrb[68].mxu0 }
 0x2a0   :  { %v1532_v17 = vpack.c.bf16 %v1462_v2, %v1460_v24  ;;  %v1718_v19 = vadd.f32 %v3052_v9, %v1717_v8  ;;  %v1719_v20 = vpop.f32.mrb[69].mxu0 }
 0x2a1   :  { %v1533_v21 = vpack.c.bf16 %v1463_v18, %v1461_v4  ;;  %v1319_v22 = vpop.f32.mrb[180].mxu1  ;;  %v1720_v26 = vpop.f32.mrb[70].mxu0 }
 0x2a2   :  { %1966 = vst [vmem:[#allocation2 + $0x10] sm:$0xff] %v1718_v19  ;;  %v1320_v31 = vadd.f32 %v1319_v22, %v2921_v16  ;;  %v1721_v33 = vadd.f32 %v3052_v9, %v1720_v26  ;;  %v1321_v34 = vpop.f32.mrb[181].mxu1  ;;  %v1722_v14 = vpop.f32.mrb[71].mxu0 }
 0x2a3   :  { %v1322_v36 = vadd.f32 %v1321_v34, %v2926_v52  ;;  %v1323_v38 = vpop.f32.mrb[182].mxu1  ;;  %1931 = vmatprep.mubr.bf16.mxu0 %v1533_v21 }
 0x2a4   :  { %1967 = vst [vmem:[#allocation2 + $0x18] sm:$0xff] %v1721_v33  ;;  %v1324_v3 = vadd.f32 %v1323_v38, %v2921_v16  ;;  %v1325_v40 = vpop.f32.mrb[183].mxu1  ;;  %1932 = vmatmul.mubr.bf16.gmra.mrb[176].mxu0 %v1532_v17  ;;  %v1464_v43 = vmax.f32 %v1320_v31, 0.0 }
 0x2a5   :  { %v1326_v42 = vadd.f32 %v1325_v40, %v2926_v52  ;;  %v1465_v45 = vmax.f32 %v1322_v36, 0.0 }
 0x2a6   :  { %v1466_v44 = vmax.f32 %v1324_v3, 0.0 }
 0x2a7   :  { %v1467_v15 = vmax.f32 %v1326_v42, 0.0  ;;  %v1725_v54 = vpop.f32.mrb[72].mxu0 }
 0x2a8   :  { %v1534_v23 = vpack.c.bf16 %v1466_v44, %v1464_v43  ;;  %v1726_v25 = vadd.f32 %v3052_v9, %v1725_v54  ;;  %v1727_v53 = vpop.f32.mrb[73].mxu0 }
 0x2a9   :  { %v1535_v1 = vpack.c.bf16 %v1467_v15, %v1465_v45  ;;  %v1329_v56 = vpop.f32.mrb[184].mxu1  ;;  %v1728_v27 = vpop.f32.mrb[74].mxu0 }
 0x2aa   :  { %1968 = vst [vmem:[#allocation2 + $0x20] sm:$0xff] %v1726_v25  ;;  %v1330_v48 = vadd.f32 %v1329_v56, %v2921_v16  ;;  %v1729_v29 = vadd.f32 %v3052_v9, %v1728_v27  ;;  %v1331_v60 = vpop.f32.mrb[185].mxu1  ;;  %v1730_v11 = vpop.f32.mrb[75].mxu0 }
 0x2ab   :  { %v1332_v62 = vadd.f32 %v1331_v60, %v2926_v52  ;;  %v1333_v35 = vpop.f32.mrb[186].mxu1  ;;  %1939 = vmatprep.mubr.bf16.mxu0 %v1535_v1 }
 0x2ac   :  { %1969 = vst [vmem:[#allocation2 + $0x28] sm:$0xff] %v1729_v29  ;;  %v1334_v10 = vadd.f32 %v1333_v35, %v2921_v16  ;;  %v1335_v13 = vpop.f32.mrb[187].mxu1  ;;  %1940 = vmatmul.mubr.bf16.gmra.mrb[180].mxu0 %v1534_v23  ;;  %v1468_v7 = vmax.f32 %v1330_v48, 0.0 }
 0x2ad   :  { %v1336_v37 = vadd.f32 %v1335_v13, %v2926_v52  ;;  %v1469_v49 = vmax.f32 %v1332_v62, 0.0 }
 0x2ae   :  { %v1470_v47 = vmax.f32 %v1334_v10, 0.0 }
 0x2af   :  { %v1471_v46 = vmax.f32 %v1336_v37, 0.0  ;;  %v1733_v30 = vpop.f32.mrb[76].mxu0 }
 0x2b0   :  { %v1536_v32 = vpack.c.bf16 %v1470_v47, %v1468_v7  ;;  %v1734_v6 = vadd.f32 %v3052_v9, %v1733_v30  ;;  %v1735_v12 = vpop.f32.mrb[77].mxu0 }
 0x2b1   :  { %v1537_v55 = vpack.c.bf16 %v1471_v46, %v1469_v49  ;;  %v1339_v57 = vpop.f32.mrb[188].mxu1  ;;  %v1736_v39 = vpop.f32.mrb[78].mxu0 }
 0x2b2   :  { %1970 = vst [vmem:[#allocation2 + $0x30] sm:$0xff] %v1734_v6  ;;  %v1340_v41 = vadd.f32 %v1339_v57, %v2921_v16  ;;  %v1737_v28 = vadd.f32 %v3052_v9, %v1736_v39  ;;  %v1341_v50 = vpop.f32.mrb[189].mxu1  ;;  %v1738_v51 = vpop.f32.mrb[79].mxu0 }
 0x2b3   :  { %v1342_v5 = vadd.f32 %v1341_v50, %v2926_v52  ;;  %v1343_v58 = vpop.f32.mrb[190].mxu1  ;;  %1947 = vmatprep.mubr.bf16.mxu0 %v1537_v55 }
 0x2b4   :  { %1971 = vst [vmem:[#allocation2 + $0x38] sm:$0xff] %v1737_v28  ;;  %v1344_v59 = vadd.f32 %v1343_v58, %v2921_v16  ;;  %v1345_v61 = vpop.f32.mrb[191].mxu1  ;;  %1948 = vmatmul.mubr.bf16.gmra.mrb[184].mxu0 %v1536_v32  ;;  %v1472_v0 = vmax.f32 %v1340_v41, 0.0 }
 0x2b5   :  { %v1346_v63 = vadd.f32 %v1345_v61, %v2926_v52  ;;  %v1473_v2 = vmax.f32 %v1342_v5, 0.0 }
 0x2b6   :  { %v1474_v24 = vmax.f32 %v1344_v59, 0.0 }
 0x2b7   :  { %v1475_v4 = vmax.f32 %v1346_v63, 0.0  ;;  %v1741_v18 = vpop.f32.mrb[80].mxu0 }
 0x2b8   :  { %v1538_v8 = vpack.c.bf16 %v1474_v24, %v1472_v0  ;;  %v1742_v17 = vadd.f32 %v3052_v9, %v1741_v18  ;;  %v1743_v19 = vpop.f32.mrb[81].mxu0 }
 0x2b9   :  { %v1539_v20 = vpack.c.bf16 %v1475_v4, %v1473_v2  ;;  %v1744_v21 = vpop.f32.mrb[82].mxu0 }
 0x2ba   :  { %1972 = vst [vmem:[#allocation2 + $0x40] sm:$0xff] %v1742_v17  ;;  %v1745_v22 = vadd.f32 %v3052_v9, %v1744_v21  ;;  %v1746_v26 = vpop.f32.mrb[83].mxu0 }
 0x2bb   :  { %1955 = vmatprep.mubr.bf16.mxu0 %v1539_v20 }
 0x2bc   :  { %1973 = vst [vmem:[#allocation2 + $0x48] sm:$0xff] %v1745_v22  ;;  %1956 = vmatmul.mubr.bf16.gmra.mrb[188].mxu0 %v1538_v8 }
 0x2bf   :  { %v1749_v16 = vpop.f32.mrb[84].mxu0 }
 0x2c0   :  { %v1750_v52 = vadd.f32 %v3052_v9, %v1749_v16  ;;  %v1751_v31 = vpop.f32.mrb[85].mxu0 }
 0x2c1   :  { %v1752_v33 = vpop.f32.mrb[86].mxu0 }
 0x2c2   :  { %1974 = vst [vmem:[#allocation2 + $0x50] sm:$0xff] %v1750_v52  ;;  %v1753_v34 = vadd.f32 %v3052_v9, %v1752_v33  ;;  %v1754_v14 = vpop.f32.mrb[87].mxu0 }
 0x2c4   :  { %1975 = vst [vmem:[#allocation2 + $0x58] sm:$0xff] %v1753_v34 }
 0x2c7   :  { %v1757_v36 = vpop.f32.mrb[88].mxu0 }
 0x2c8   :  { %v1758_v38 = vadd.f32 %v3052_v9, %v1757_v36  ;;  %v1759_v3 = vpop.f32.mrb[89].mxu0 }
 0x2c9   :  { %v1760_v40 = vpop.f32.mrb[90].mxu0 }
 0x2ca   :  { %1976 = vst [vmem:[#allocation2 + $0x60] sm:$0xff] %v1758_v38  ;;  %v1761_v42 = vadd.f32 %v3052_v9, %v1760_v40  ;;  %v1762_v43 = vpop.f32.mrb[91].mxu0 }
 0x2cc   :  { %1977 = vst [vmem:[#allocation2 + $0x68] sm:$0xff] %v1761_v42 }
 0x2cf   :  { %v1765_v44 = vpop.f32.mrb[92].mxu0 }
 0x2d0   :  { %v1766_v45 = vadd.f32 %v3052_v9, %v1765_v44  ;;  %v1767_v15 = vpop.f32.mrb[93].mxu0 }
 0x2d1   :  { %v1768_v54 = vpop.f32.mrb[94].mxu0 }
 0x2d2   :  { %1978 = vst [vmem:[#allocation2 + $0x70] sm:$0xff] %v1766_v45  ;;  %v1769_v23 = vadd.f32 %v3052_v9, %v1768_v54  ;;  %v1770_v25 = vpop.f32.mrb[95].mxu0 }
 0x2d4   :  { %1979 = vst [vmem:[#allocation2 + $0x78] sm:$0xff] %v1769_v23 }
 0x2d7   :  { %v1773_v53 = vpop.f32.mrb[96].mxu0 }
 0x2d8   :  { %v1774_v1 = vadd.f32 %v3052_v9, %v1773_v53  ;;  %v1775_v56 = vpop.f32.mrb[97].mxu0 }
 0x2d9   :  { %v1776_v27 = vpop.f32.mrb[98].mxu0 }
 0x2da   :  { %1980 = vst [vmem:[#allocation2 + $0x80] sm:$0xff] %v1774_v1  ;;  %v1777_v48 = vadd.f32 %v3052_v9, %v1776_v27  ;;  %v1778_v29 = vpop.f32.mrb[99].mxu0 }
 0x2dc   :  { %1981 = vst [vmem:[#allocation2 + $0x88] sm:$0xff] %v1777_v48 }
 0x2df   :  { %v1781_v60 = vpop.f32.mrb[100].mxu0 }
 0x2e0   :  { %v1782_v11 = vadd.f32 %v3052_v9, %v1781_v60  ;;  %v1783_v62 = vpop.f32.mrb[101].mxu0 }
 0x2e1   :  { %v1784_v35 = vpop.f32.mrb[102].mxu0 }
 0x2e2   :  { %1982 = vst [vmem:[#allocation2 + $0x90] sm:$0xff] %v1782_v11  ;;  %v1785_v10 = vadd.f32 %v3052_v9, %v1784_v35  ;;  %v1786_v13 = vpop.f32.mrb[103].mxu0 }
 0x2e4   :  { %1983 = vst [vmem:[#allocation2 + $0x98] sm:$0xff] %v1785_v10 }
 0x2e7   :  { %v1789_v37 = vpop.f32.mrb[104].mxu0 }
 0x2e8   :  { %v1790_v7 = vadd.f32 %v3052_v9, %v1789_v37  ;;  %v1791_v47 = vpop.f32.mrb[105].mxu0 }
 0x2e9   :  { %v1792_v49 = vpop.f32.mrb[106].mxu0 }
 0x2ea   :  { %1984 = vst [vmem:[#allocation2 + $0xa0] sm:$0xff] %v1790_v7  ;;  %v1793_v46 = vadd.f32 %v3052_v9, %v1792_v49  ;;  %v1794_v30 = vpop.f32.mrb[107].mxu0 }
 0x2ec   :  { %1985 = vst [vmem:[#allocation2 + $0xa8] sm:$0xff] %v1793_v46 }
 0x2ef   :  { %v1797_v32 = vpop.f32.mrb[108].mxu0 }
 0x2f0   :  { %v1798_v6 = vadd.f32 %v3052_v9, %v1797_v32  ;;  %v1799_v12 = vpop.f32.mrb[109].mxu0 }
 0x2f1   :  { %v1800_v55 = vpop.f32.mrb[110].mxu0 }
 0x2f2   :  { %1986 = vst [vmem:[#allocation2 + $0xb0] sm:$0xff] %v1798_v6  ;;  %v1801_v57 = vadd.f32 %v3052_v9, %v1800_v55  ;;  %v1802_v39 = vpop.f32.mrb[111].mxu0 }
 0x2f4   :  { %1987 = vst [vmem:[#allocation2 + $0xb8] sm:$0xff] %v1801_v57 }
 0x2f7   :  { %v1805_v41 = vpop.f32.mrb[112].mxu0 }
 0x2f8   :  { %v1806_v28 = vadd.f32 %v3052_v9, %v1805_v41  ;;  %v1807_v50 = vpop.f32.mrb[113].mxu0 }
 0x2f9   :  { %v1808_v51 = vpop.f32.mrb[114].mxu0 }
 0x2fa   :  { %1988 = vst [vmem:[#allocation2 + $0xc0] sm:$0xff] %v1806_v28  ;;  %v1809_v5 = vadd.f32 %v3052_v9, %v1808_v51  ;;  %v1810_v58 = vpop.f32.mrb[115].mxu0 }
 0x2fc   :  { %1989 = vst [vmem:[#allocation2 + $0xc8] sm:$0xff] %v1809_v5 }
 0x2ff   :  { %v1813_v59 = vpop.f32.mrb[116].mxu0 }
 0x300   :  { %v1814_v61 = vadd.f32 %v3052_v9, %v1813_v59  ;;  %v1815_v63 = vpop.f32.mrb[117].mxu0 }
 0x301   :  { %v1816_v0 = vpop.f32.mrb[118].mxu0 }
 0x302   :  { %1990 = vst [vmem:[#allocation2 + $0xd0] sm:$0xff] %v1814_v61  ;;  %v1817_v24 = vadd.f32 %v3052_v9, %v1816_v0  ;;  %v1818_v2 = vpop.f32.mrb[119].mxu0 }
 0x304   :  { %1991 = vst [vmem:[#allocation2 + $0xd8] sm:$0xff] %v1817_v24 }
 0x307   :  { %v1821_v4 = vpop.f32.mrb[120].mxu0 }
 0x308   :  { %v1822_v18 = vadd.f32 %v3052_v9, %v1821_v4  ;;  %v1823_v8 = vpop.f32.mrb[121].mxu0 }
 0x309   :  { %v1824_v17 = vpop.f32.mrb[122].mxu0 }
 0x30a   :  { %1992 = vst [vmem:[#allocation2 + $0xe0] sm:$0xff] %v1822_v18  ;;  %v1825_v19 = vadd.f32 %v3052_v9, %v1824_v17  ;;  %v1826_v20 = vpop.f32.mrb[123].mxu0 }
 0x30c   :  { %1993 = vst [vmem:[#allocation2 + $0xe8] sm:$0xff] %v1825_v19 }
 0x30f   :  { %v1829_v21 = vpop.f32.mrb[124].mxu0 }
 0x310   :  { %v1830_v22 = vadd.f32 %v3052_v9, %v1829_v21  ;;  %v1831_v26 = vpop.f32.mrb[125].mxu0 }
 0x311   :  { %v1832_v16 = vpop.f32.mrb[126].mxu0 }
 0x312   :  { %1994 = vst [vmem:[#allocation2 + $0xf0] sm:$0xff] %v1830_v22  ;;  %v1833_v52 = vadd.f32 %v3052_v9, %v1832_v16  ;;  %v1834_v31 = vpop.f32.mrb[127].mxu0 }
 0x314   :  { %1995 = vst [vmem:[#allocation2 + $0xf8] sm:$0xff] %v1833_v52 }
 0x317   :  { %v1837_v33 = vpop.f32.mrb[128].mxu0 }
 0x318   :  { %v1838_v34 = vadd.f32 %v3052_v9, %v1837_v33  ;;  %v1839_v14 = vpop.f32.mrb[129].mxu0 }
 0x319   :  { %v1840_v36 = vpop.f32.mrb[130].mxu0 }
 0x31a   :  { %1996 = vst [vmem:[#allocation2 + $0x100] sm:$0xff] %v1838_v34  ;;  %v1841_v38 = vadd.f32 %v3052_v9, %v1840_v36  ;;  %v1842_v3 = vpop.f32.mrb[131].mxu0 }
 0x31c   :  { %1997 = vst [vmem:[#allocation2 + $0x108] sm:$0xff] %v1841_v38 }
 0x31f   :  { %v1845_v40 = vpop.f32.mrb[132].mxu0 }
 0x320   :  { %v1846_v42 = vadd.f32 %v3052_v9, %v1845_v40  ;;  %v1847_v43 = vpop.f32.mrb[133].mxu0 }
 0x321   :  { %v1848_v44 = vpop.f32.mrb[134].mxu0 }
 0x322   :  { %1998 = vst [vmem:[#allocation2 + $0x110] sm:$0xff] %v1846_v42  ;;  %v1849_v45 = vadd.f32 %v3052_v9, %v1848_v44  ;;  %v1850_v15 = vpop.f32.mrb[135].mxu0 }
 0x324   :  { %1999 = vst [vmem:[#allocation2 + $0x118] sm:$0xff] %v1849_v45 }
 0x327   :  { %v1853_v54 = vpop.f32.mrb[136].mxu0 }
 0x328   :  { %v1854_v23 = vadd.f32 %v3052_v9, %v1853_v54  ;;  %v1855_v25 = vpop.f32.mrb[137].mxu0 }
 0x329   :  { %v1856_v53 = vpop.f32.mrb[138].mxu0 }
 0x32a   :  { %2000 = vst [vmem:[#allocation2 + $0x120] sm:$0xff] %v1854_v23  ;;  %v1857_v1 = vadd.f32 %v3052_v9, %v1856_v53  ;;  %v1858_v56 = vpop.f32.mrb[139].mxu0 }
 0x32c   :  { %2001 = vst [vmem:[#allocation2 + $0x128] sm:$0xff] %v1857_v1 }
 0x32f   :  { %v1861_v27 = vpop.f32.mrb[140].mxu0 }
 0x330   :  { %v1862_v48 = vadd.f32 %v3052_v9, %v1861_v27  ;;  %v1863_v29 = vpop.f32.mrb[141].mxu0 }
 0x331   :  { %v1864_v60 = vpop.f32.mrb[142].mxu0 }
 0x332   :  { %2002 = vst [vmem:[#allocation2 + $0x130] sm:$0xff] %v1862_v48  ;;  %v1865_v11 = vadd.f32 %v3052_v9, %v1864_v60  ;;  %v1866_v62 = vpop.f32.mrb[143].mxu0 }
 0x334   :  { %2003 = vst [vmem:[#allocation2 + $0x138] sm:$0xff] %v1865_v11 }
 0x337   :  { %v1869_v35 = vpop.f32.mrb[144].mxu0 }
 0x338   :  { %v1870_v10 = vadd.f32 %v3052_v9, %v1869_v35  ;;  %v1871_v13 = vpop.f32.mrb[145].mxu0 }
 0x339   :  { %v1872_v37 = vpop.f32.mrb[146].mxu0 }
 0x33a   :  { %2004 = vst [vmem:[#allocation2 + $0x140] sm:$0xff] %v1870_v10  ;;  %v1873_v7 = vadd.f32 %v3052_v9, %v1872_v37  ;;  %v1874_v47 = vpop.f32.mrb[147].mxu0 }
 0x33c   :  { %2005 = vst [vmem:[#allocation2 + $0x148] sm:$0xff] %v1873_v7 }
 0x33f   :  { %v1877_v49 = vpop.f32.mrb[148].mxu0 }
 0x340   :  { %v1878_v46 = vadd.f32 %v3052_v9, %v1877_v49  ;;  %v1879_v30 = vpop.f32.mrb[149].mxu0 }
 0x341   :  { %v1880_v32 = vpop.f32.mrb[150].mxu0 }
 0x342   :  { %2006 = vst [vmem:[#allocation2 + $0x150] sm:$0xff] %v1878_v46  ;;  %v1881_v6 = vadd.f32 %v3052_v9, %v1880_v32  ;;  %v1882_v12 = vpop.f32.mrb[151].mxu0 }
 0x344   :  { %2007 = vst [vmem:[#allocation2 + $0x158] sm:$0xff] %v1881_v6 }
 0x347   :  { %v1885_v55 = vpop.f32.mrb[152].mxu0 }
 0x348   :  { %v1886_v57 = vadd.f32 %v3052_v9, %v1885_v55  ;;  %v1887_v39 = vpop.f32.mrb[153].mxu0 }
 0x349   :  { %v1888_v41 = vpop.f32.mrb[154].mxu0 }
 0x34a   :  { %2008 = vst [vmem:[#allocation2 + $0x160] sm:$0xff] %v1886_v57  ;;  %v1889_v28 = vadd.f32 %v3052_v9, %v1888_v41  ;;  %v1890_v50 = vpop.f32.mrb[155].mxu0 }
 0x34c   :  { %2009 = vst [vmem:[#allocation2 + $0x168] sm:$0xff] %v1889_v28 }
 0x34f   :  { %v1893_v51 = vpop.f32.mrb[156].mxu0 }
 0x350   :  { %v1894_v5 = vadd.f32 %v3052_v9, %v1893_v51  ;;  %v1895_v58 = vpop.f32.mrb[157].mxu0 }
 0x351   :  { %v1896_v59 = vpop.f32.mrb[158].mxu0 }
 0x352   :  { %2010 = vst [vmem:[#allocation2 + $0x170] sm:$0xff] %v1894_v5  ;;  %v1897_v61 = vadd.f32 %v3052_v9, %v1896_v59  ;;  %v1898_v63 = vpop.f32.mrb[159].mxu0 }
 0x354   :  { %2011 = vst [vmem:[#allocation2 + $0x178] sm:$0xff] %v1897_v61 }
 0x357   :  { %v1901_v0 = vpop.f32.mrb[160].mxu0 }
 0x358   :  { %v1902_v24 = vadd.f32 %v3052_v9, %v1901_v0  ;;  %v1903_v2 = vpop.f32.mrb[161].mxu0 }
 0x359   :  { %v1904_v4 = vpop.f32.mrb[162].mxu0 }
 0x35a   :  { %2012 = vst [vmem:[#allocation2 + $0x180] sm:$0xff] %v1902_v24  ;;  %v1905_v18 = vadd.f32 %v3052_v9, %v1904_v4  ;;  %v1906_v8 = vpop.f32.mrb[163].mxu0 }
 0x35c   :  { %2013 = vst [vmem:[#allocation2 + $0x188] sm:$0xff] %v1905_v18 }
 0x35f   :  { %v1909_v17 = vpop.f32.mrb[164].mxu0 }
 0x360   :  { %v1910_v19 = vadd.f32 %v3052_v9, %v1909_v17  ;;  %v1911_v20 = vpop.f32.mrb[165].mxu0 }
 0x361   :  { %v1912_v21 = vpop.f32.mrb[166].mxu0 }
 0x362   :  { %2014 = vst [vmem:[#allocation2 + $0x190] sm:$0xff] %v1910_v19  ;;  %v1913_v22 = vadd.f32 %v3052_v9, %v1912_v21  ;;  %v1914_v26 = vpop.f32.mrb[167].mxu0 }
 0x364   :  { %2015 = vst [vmem:[#allocation2 + $0x198] sm:$0xff] %v1913_v22 }
 0x367   :  { %v1917_v16 = vpop.f32.mrb[168].mxu0 }
 0x368   :  { %v1918_v52 = vadd.f32 %v3052_v9, %v1917_v16  ;;  %v1919_v31 = vpop.f32.mrb[169].mxu0 }
 0x369   :  { %v1920_v33 = vpop.f32.mrb[170].mxu0 }
 0x36a   :  { %2016 = vst [vmem:[#allocation2 + $0x1a0] sm:$0xff] %v1918_v52  ;;  %v1921_v34 = vadd.f32 %v3052_v9, %v1920_v33  ;;  %v1922_v14 = vpop.f32.mrb[171].mxu0 }
 0x36c   :  { %2017 = vst [vmem:[#allocation2 + $0x1a8] sm:$0xff] %v1921_v34 }
 0x36f   :  { %v1925_v36 = vpop.f32.mrb[172].mxu0 }
 0x370   :  { %v1926_v38 = vadd.f32 %v3052_v9, %v1925_v36  ;;  %v1927_v3 = vpop.f32.mrb[173].mxu0 }
 0x371   :  { %v1928_v40 = vpop.f32.mrb[174].mxu0 }
 0x372   :  { %2018 = vst [vmem:[#allocation2 + $0x1b0] sm:$0xff] %v1926_v38  ;;  %v1929_v42 = vadd.f32 %v3052_v9, %v1928_v40  ;;  %v1930_v43 = vpop.f32.mrb[175].mxu0 }
 0x374   :  { %2019 = vst [vmem:[#allocation2 + $0x1b8] sm:$0xff] %v1929_v42 }
 0x377   :  { %v1933_v44 = vpop.f32.mrb[176].mxu0 }
 0x378   :  { %v1934_v45 = vadd.f32 %v3052_v9, %v1933_v44  ;;  %v1935_v15 = vpop.f32.mrb[177].mxu0 }
 0x379   :  { %v1936_v54 = vpop.f32.mrb[178].mxu0 }
 0x37a   :  { %2020 = vst [vmem:[#allocation2 + $0x1c0] sm:$0xff] %v1934_v45  ;;  %v1937_v23 = vadd.f32 %v3052_v9, %v1936_v54  ;;  %v1938_v25 = vpop.f32.mrb[179].mxu0 }
 0x37c   :  { %2021 = vst [vmem:[#allocation2 + $0x1c8] sm:$0xff] %v1937_v23 }
 0x37f   :  { %v1941_v53 = vpop.f32.mrb[180].mxu0 }
 0x380   :  { %v1942_v1 = vadd.f32 %v3052_v9, %v1941_v53  ;;  %v1943_v56 = vpop.f32.mrb[181].mxu0 }
 0x381   :  { %v1944_v27 = vpop.f32.mrb[182].mxu0 }
 0x382   :  { %2022 = vst [vmem:[#allocation2 + $0x1d0] sm:$0xff] %v1942_v1  ;;  %v1945_v48 = vadd.f32 %v3052_v9, %v1944_v27  ;;  %v1946_v29 = vpop.f32.mrb[183].mxu0 }
 0x384   :  { %2023 = vst [vmem:[#allocation2 + $0x1d8] sm:$0xff] %v1945_v48 }
 0x387   :  { %v1949_v60 = vpop.f32.mrb[184].mxu0 }
 0x388   :  { %v1950_v11 = vadd.f32 %v3052_v9, %v1949_v60  ;;  %v1951_v62 = vpop.f32.mrb[185].mxu0 }
 0x389   :  { %v1952_v35 = vpop.f32.mrb[186].mxu0 }
 0x38a   :  { %2024 = vst [vmem:[#allocation2 + $0x1e0] sm:$0xff] %v1950_v11  ;;  %v1953_v10 = vadd.f32 %v3052_v9, %v1952_v35  ;;  %v1954_v13 = vpop.f32.mrb[187].mxu0 }
 0x38c   :  { %2025 = vst [vmem:[#allocation2 + $0x1e8] sm:$0xff] %v1953_v10 }
 0x38f   :  { %v1957_v37 = vpop.f32.mrb[188].mxu0 }
 0x390   :  { %v1958_v7 = vadd.f32 %v3052_v9, %v1957_v37  ;;  %v1959_v47 = vpop.f32.mrb[189].mxu0 }
 0x391   :  { %v1960_v49 = vpop.f32.mrb[190].mxu0 }
 0x392   :  { %2026 = vst [vmem:[#allocation2 + $0x1f0] sm:$0xff] %v1958_v7  ;;  %v1961_v46 = vadd.f32 %v3052_v9, %v1960_v49  ;;  %v1962_v30 = vpop.f32.mrb[191].mxu0 }
 0x394   :  { %2027 = vst [vmem:[#allocation2 + $0x1f8] sm:$0xff] %v1961_v46 }
 0x395   :  { %2211 = shalt.err (!%p2208_p4)
}
 0x396   :  { %s2212_s11 = scalar_lea.hbm %s3153_s7, 8192 }
 0x397   :  { %p2213_p5 = scmp.ne.s32.totalorder %s3153_s7, %s2212_s11  ;;  %p2216_p6 = scmp.lt.u32.totalorder %s2212_s11, %s3153_s7 }
 0x399   :  { %p2218_p7 = pnand %p2216_p6, %p2213_p5 }
 0x39b   :  { %2221 = shalt.err (!%p2218_p7)
}
 0x39c   :  { %s2226_s16 = smov 128   ;;  %s2227_s17 = smov 8  }
 0x39d   :  { %2039 = dma.vmem_to_hbm [thread:$0]  %s2034_s2, 8192, %s3153_s7, [#allocation3], %s2226_s16, %s2226_s16, %s2227_s17  }
 0x39e   :  { %2222 = dma.done.wait [#allocation3], 8192  }
 0x39f   :  { %2223 = vsyncadd [#allocation3], 4294959104 }
 0x3a0   :  { %2043 = vsyncpa [#allocation3], 1 }

</bundles_post_ra>
